<compile_context>
chip_gen: v5e
topology: v5e:2x2
jax: 0.10.0
libtpu: 0.0.40
codegen_flags: <defaults>
</compile_context>

<pallas_src>
import math

import jax
import jax.numpy as jnp
from jax import lax
from jax.experimental import pallas as pl
from jax.experimental.pallas import tpu as pltpu


BN_EPS = 1e-5
_VMEM_LIMIT = 48 * 1024 * 1024          # sized for v7x (64 MiB physical VMEM)


# --------------------------------------------------------------------------- helpers
def _ru(x, m):
    return ((x + m - 1) // m) * m


def _pick_m_tile(m, kp):
    """M tile: large (1024 when K is small, else 512), but always >= 2 grid steps
    when possible so both v7x TensorCores get work.  Multiple of 16 (bf16 sublanes)."""
    target = 1024 if kp <= 640 else 512
    mp = _ru(m, 16)
    if mp > target:
        tm = target
    elif mp >= 32:
        tm = _ru((mp + 1) // 2, 16)      # at least two tiles
    else:
        tm = mp
    return tm, _ru(m, tm)


def _pick_k_tile(kp):
    """K tile: multiple of 128 dividing Kp, <= 512, and >= 2 steps when Kp > 128 so
    the f32 accumulator pipeline has DMA/compute overlap."""
    n = kp // 128
    if n <= 1:
        return kp
    best = 128
    for d in range(1, n):
        if n % d == 0 and d * 128 <= 512:
            best = d * 128
    return best


# --------------------------------------------------------------------------- kernels
def _conv_bn_stats_kernel(a_ref, w_ref, o_ref, st_ref, acc_ref):
    """bf16 GEMM with f32 accumulation; on the last K step writes the f32 output tile
    and its per-channel column sum / sum-of-squares (fused BatchNorm statistics)."""
    k = pl.program_id(1)

    @pl.when(k == 0)
    def _init():
        acc_ref[...] = jnp.zeros_like(acc_ref)

    acc_ref[...] += jnp.dot(a_ref[...], w_ref[...],
                            preferred_element_type=jnp.float32)

    @pl.when(k == pl.num_programs(1) - 1)
    def _epilogue():
        y = acc_ref[...]
        o_ref[...] = y
        col_sum = jnp.sum(y, axis=0, keepdims=True)          # (1, Np)
        col_sq = jnp.sum(y * y, axis=0, keepdims=True)       # (1, Np)
        rid = lax.broadcasted_iota(jnp.int32, (8, y.shape[1]), 0)
        st_ref[...] = jnp.where(rid == 0, col_sum,
                                jnp.where(rid == 1, col_sq, 0.0))


def _affine_relu_kernel(x_ref, s_ref, t_ref, u_ref, o_ref):
    """y = relu(x*scale + shift) + post_bias (per channel), cast to output dtype."""
    y = jnp.maximum(x_ref[...] * s_ref[...] + t_ref[...], 0.0) + u_ref[...]
    o_ref[...] = y.astype(o_ref.dtype)


# --------------------------------------------------------------------------- layer
def _conv3x3_bn_relu(x_nhwc, wmat, gamma, beta, post_bias, out_dtype):
    """Conv2D(3x3, pad=1, bias cancelled by BN) -> BatchNorm2d(batch stats) -> ReLU.

    x_nhwc    : (N, H, W, Cin), dirac-1x1 bias already added (zero-padding happens here,
                i.e. in the post-bias domain, matching nn.Conv2d(padding=1)).
    wmat      : (Kp, Np) bf16 pre-padded weight matrix (built at param time).
    post_bias : (Cout,) dirac-1x1 bias of the *next* Conv2D, fused into the epilogue
                (None for the last layer).
    """
    N, H, W, Cin = x_nhwc.shape
    Kp, Np = wmat.shape
    Cout = gamma.shape[0]
    M = N * H * W

    # im2col, materialised directly in bf16 with the K axis already padded to Kp
    # (no second full-array jnp.pad pass).
    xp = jnp.pad(x_nhwc.astype(jnp.bfloat16), ((0, 0), (1, 1), (1, 1), (0, 0)))
    taps = [xp[:, kh:kh + H, kw:kw + W, :] for kh in range(3) for kw in range(3)]
    if Kp > 9 * Cin:
        taps.append(jnp.zeros((N, H, W, Kp - 9 * Cin), jnp.bfloat16))
    a = jnp.concatenate(taps, axis=-1).reshape(M, Kp)

    tm, Mp = _pick_m_tile(M, Kp)
    tk = _pick_k_tile(Kp)
    if Mp > M:
        a = jnp.pad(a, ((0, Mp - M), (0, 0)))       # zero rows -> contribute 0 to stats
    m_tiles, k_tiles = Mp // tm, Kp // tk

    out, stats = pl.pallas_call(
        _conv_bn_stats_kernel,
        out_shape=(
            jax.ShapeDtypeStruct((Mp, Np), jnp.float32),
            jax.ShapeDtypeStruct((m_tiles * 8, Np), jnp.float32),
        ),
        grid_spec=pltpu.PrefetchScalarGridSpec(
            num_scalar_prefetch=0,
            grid=(m_tiles, k_tiles),
            in_specs=[
                pl.BlockSpec((tm, tk), lambda i, k: (i, k)),
                pl.BlockSpec((tk, Np), lambda i, k: (k, 0)),
            ],
            out_specs=(
                pl.BlockSpec((tm, Np), lambda i, k: (i, 0)),
                pl.BlockSpec((8, Np), lambda i, k: (i, 0)),
            ),
            scratch_shapes=[pltpu.VMEM((tm, Np), jnp.float32)],
        ),
        compiler_params=pltpu.CompilerParams(
            dimension_semantics=("parallel", "arbitrary"),
            vmem_limit_bytes=_VMEM_LIMIT,
        ),
    )(a, wmat)

    # BatchNorm batch statistics (biased variance, eps=1e-5) from the fused sums.
    st = jnp.sum(stats.reshape(m_tiles, 8, Np), axis=0)
    mean = st[0, :Cout] / M
    var = jnp.maximum(st[1, :Cout] / M - mean * mean, 0.0)
    scale = gamma * lax.rsqrt(var + BN_EPS)
    shift = beta - mean * scale
    if post_bias is None:
        post_bias = jnp.zeros((Cout,), jnp.float32)

    def pad_vec(v):
        return jnp.pad(v.astype(jnp.float32), (0, Np - Cout)).reshape(1, Np)

    y = pl.pallas_call(
        _affine_relu_kernel,
        out_shape=jax.ShapeDtypeStruct((Mp, Np), out_dtype),
        grid_spec=pltpu.PrefetchScalarGridSpec(
            num_scalar_prefetch=0,
            grid=(m_tiles,),
            in_specs=[
                pl.BlockSpec((tm, Np), lambda i: (i, 0)),
                pl.BlockSpec((1, Np), lambda i: (0, 0)),
                pl.BlockSpec((1, Np), lambda i: (0, 0)),
                pl.BlockSpec((1, Np), lambda i: (0, 0)),
            ],
            out_specs=pl.BlockSpec((tm, Np), lambda i: (i, 0)),
        ),
        compiler_params=pltpu.CompilerParams(
            dimension_semantics=("parallel",),
            vmem_limit_bytes=_VMEM_LIMIT,
        ),
    )(out, pad_vec(scale), pad_vec(shift), pad_vec(post_bias))

    return y[:M, :Cout].reshape(N, H, W, Cout)


# --------------------------------------------------------------------------- forward
def down_forward(params, x):
    """Down(in_ch, out_ch).forward(x): MaxPool2d(2) -> DoubleConv.  NCHW in / NCHW out."""
    N, C, H, W = x.shape
    # MaxPool2d(2)
    h = x.reshape(N, C, H // 2, 2, W // 2, 2).max(axis=(3, 5))
    h = h.transpose(0, 2, 3, 1)                                   # NHWC

    p1, p2 = params['conv1'], params['conv2']
    # Conv2D's dirac 1x1 pre-conv == identity + per-channel bias, applied before the
    # 3x3 conv's zero padding.  Layer-2's pre-bias is fused into layer-1's epilogue.
    h = h + p1['pre_bias']
    h = _conv3x3_bn_relu(h, p1['wmat'], params['bn1']['gamma'], params['bn1']['beta'],
                         post_bias=p2['pre_bias'], out_dtype=jnp.bfloat16)
    h = _conv3x3_bn_relu(h, p2['wmat'], params['bn2']['gamma'], params['bn2']['beta'],
                         post_bias=None, out_dtype=jnp.float32)
    return h.transpose(0, 3, 1, 2)                                # NCHW


# --------------------------------------------------------------------------- params
def _prep_conv_weight(w):
    """Pre-reshape / pad / cast the conv weight once at parameter-build time."""
    cout, cin, kh, kw = w.shape
    k = cin * kh * kw
    kp, np_ = _ru(k, 128), _ru(cout, 128)
    wmat = jnp.transpose(w, (2, 3, 1, 0)).reshape(k, cout)        # rows: (kh,kw,ci)
    return jnp.pad(wmat, ((0, kp - k), (0, np_ - cout))).astype(jnp.bfloat16)


def make_down_params(key, in_ch, out_ch):
    mid = out_ch                                                   # DoubleConv default
    ks = jax.random.split(key, 6)

    def conv2d_params(kw_, kb_, kp_, cin, cout):
        w = jax.random.normal(kw_, (cout, cin, 3, 3), jnp.float32) / math.sqrt(cin * 9)
        b = jax.random.normal(kb_, (cout,), jnp.float32) * 0.1     # cancelled by BN
        pre_b = jax.random.normal(kp_, (cin,), jnp.float32) / math.sqrt(cin)
        return {'w': w, 'b': b, 'pre_bias': pre_b, 'wmat': _prep_conv_weight(w)}

    return {
        'conv1': conv2d_params(ks[0], ks[1], ks[2], in_ch, mid),
        'conv2': conv2d_params(ks[3], ks[4], ks[5], mid, out_ch),
        'bn1': {'gamma': jnp.ones((mid,), jnp.float32),
                'beta': jnp.zeros((mid,), jnp.float32)},
        'bn2': {'gamma': jnp.ones((out_ch,), jnp.float32),
                'beta': jnp.zeros((out_ch,), jnp.float32)},
    }


# --------------------------------------------------------------------------- reference
def down_reference(params, x):
    """Pure-JAX f32 reference with the PyTorch math (including the conv bias, which
    BatchNorm cancels -- proves the compute-path simplification is exact)."""
    N, C, H, W = x.shape
    h = x.reshape(N, C, H // 2, 2, W // 2, 2).max(axis=(3, 5))
    for conv_key, bn_key in (('conv1', 'bn1'), ('conv2', 'bn2')):
        p, bn = params[conv_key], params[bn_key]
        h = h + p['pre_bias'][None, :, None, None]
        h = lax.conv_general_dilated(
            h, p['w'], window_strides=(1, 1), padding=((1, 1), (1, 1)),
            dimension_numbers=('NCHW', 'OIHW', 'NCHW'),
            precision=lax.Precision.HIGHEST)
        h = h + p['b'][None, :, None, None]
        mean = h.mean(axis=(0, 2, 3), keepdims=True)
        var = h.var(axis=(0, 2, 3), keepdims=True)
        h = (h - mean) * lax.rsqrt(var + BN_EPS)
        h = h * bn['gamma'][None, :, None, None] + bn['beta'][None, :, None, None]
        h = jnp.maximum(h, 0.0)
    return h


# --------------------------------------------------------------------------- main
if __name__ == "__main__":
    IN_CH, OUT_CH = 16, 32
    N, H, W = 2, 32, 32

    key = jax.random.PRNGKey(0)
    kx, kparam = jax.random.split(key)
    x = jax.random.normal(kx, (N, IN_CH, H, W), jnp.float32)
    params = make_down_params(kparam, IN_CH, OUT_CH)

    out = jax.block_until_ready(jax.jit(down_forward)(params, x))
    assert out.shape == (N, OUT_CH, H // 2, W // 2), out.shape
    assert bool(jnp.all(jnp.isfinite(out)))

    ref = jax.block_until_ready(jax.jit(down_reference)(params, x))
    err = float(jnp.max(jnp.abs(out - ref)))
    assert err < 0.3, f"mismatch vs f32 reference: max abs err {err}"

    print("KERNEL_OK")
</pallas_src>

<mosaic_0001>
module attributes {stable_mosaic.version = 11 : i64} {
  func.func @_conv_bn_stats_kernel(%arg0: i32, %arg1: i32, %arg2: memref<256x128xbf16, #tpu.memory_space<vmem>>, %arg3: memref<128x128xbf16, #tpu.memory_space<vmem>>, %arg4: memref<256x128xf32, #tpu.memory_space<vmem>>, %arg5: memref<8x128xf32, #tpu.memory_space<vmem>>, %arg6: memref<256x128xf32, #tpu.memory_space<vmem>>) attributes {dimension_semantics = [#tpu.dimension_semantics<parallel>, #tpu.dimension_semantics<arbitrary>], iteration_bounds = array<i64: 2, 2>, scalar_prefetch = 0 : i64, scratch_operands = 1 : i64, tpu.core_type = #tpu.core_type<tc>, window_params = [{transform_indices = @transform_0, window_bounds = array<i64: 256, 128>}, {transform_indices = @transform_1, window_bounds = array<i64: 128, 128>}, {transform_indices = @transform_2, window_bounds = array<i64: 256, 128>}, {transform_indices = @transform_3, window_bounds = array<i64: 8, 128>}]} {
    %c0_i32 = arith.constant 0 : i32
    %0 = arith.cmpi eq, %arg1, %c0_i32 : i32
    %1 = arith.extui %0 : i1 to i32
    %c0_i32_0 = arith.constant 0 : i32
    %2 = arith.cmpi ne, %1, %c0_i32_0 : i32
    scf.if %2 {
      %cst_9 = arith.constant 0.000000e+00 : f32
      %12 = vector.broadcast %cst_9 : f32 to vector<256x128xf32>
      %c0_10 = arith.constant 0 : index
      %c0_11 = arith.constant 0 : index
      %13 = vector.load %arg6[%c0_10, %c0_11] : memref<256x128xf32, #tpu.memory_space<vmem>>, vector<256x128xf32>
      tpu.vector_store %arg6[%c0_10, %c0_11], %12 {strides = array<i32>} : memref<256x128xf32, #tpu.memory_space<vmem>>, vector<256x128xf32>,
    } else {
    }
    %c0 = arith.constant 0 : index
    %c0_1 = arith.constant 0 : index
    %3 = vector.load %arg6[%c0, %c0_1] : memref<256x128xf32, #tpu.memory_space<vmem>>, vector<256x128xf32>
    %c0_2 = arith.constant 0 : index
    %c0_3 = arith.constant 0 : index
    %4 = vector.load %arg2[%c0_2, %c0_3] : memref<256x128xbf16, #tpu.memory_space<vmem>>, vector<256x128xbf16>
    %c0_4 = arith.constant 0 : index
    %c0_5 = arith.constant 0 : index
    %5 = vector.load %arg3[%c0_4, %c0_5] : memref<128x128xbf16, #tpu.memory_space<vmem>>, vector<128x128xbf16>
    %cst = arith.constant dense<0.000000e+00> : vector<256x128xf32>
    %6 = tpu.matmul %4, %5, %cst {dimension_numbers = #tpu.dot_dimension_numbers<[1], [0], [0], [1], [0, 0, 1, 1], [], []>} : vector<256x128xbf16>, vector<128x128xbf16>, vector<256x128xf32> -> vector<256x128xf32>
    %7 = arith.addf %3, %6 : vector<256x128xf32>
    %c0_6 = arith.constant 0 : index
    %c0_7 = arith.constant 0 : index
    %8 = vector.load %arg6[%c0_6, %c0_7] : memref<256x128xf32, #tpu.memory_space<vmem>>, vector<256x128xf32>
    tpu.vector_store %arg6[%c0_6, %c0_7], %7 {strides = array<i32>} : memref<256x128xf32, #tpu.memory_space<vmem>>, vector<256x128xf32>,
    %c1_i32 = arith.constant 1 : i32
    %9 = arith.cmpi eq, %arg1, %c1_i32 : i32
    %10 = arith.extui %9 : i1 to i32
    %c0_i32_8 = arith.constant 0 : i32
    %11 = arith.cmpi ne, %10, %c0_i32_8 : i32
    scf.if %11 {
      %c0_9 = arith.constant 0 : index
      %c0_10 = arith.constant 0 : index
      %12 = vector.load %arg6[%c0_9, %c0_10] : memref<256x128xf32, #tpu.memory_space<vmem>>, vector<256x128xf32>
      %c0_11 = arith.constant 0 : index
      %c0_12 = arith.constant 0 : index
      %13 = vector.load %arg4[%c0_11, %c0_12] : memref<256x128xf32, #tpu.memory_space<vmem>>, vector<256x128xf32>
      tpu.vector_store %arg4[%c0_11, %c0_12], %12 {strides = array<i32>} : memref<256x128xf32, #tpu.memory_space<vmem>>, vector<256x128xf32>,
      %cst_13 = arith.constant dense<0.000000e+00> : vector<128xf32>
      %14 = vector.multi_reduction <add>, %12, %cst_13 [0] : vector<256x128xf32> to vector<128xf32>
      %15 = vector.shape_cast %14 : vector<128xf32> to vector<1x128xf32>
      %16 = arith.mulf %12, %12 : vector<256x128xf32>
      %cst_14 = arith.constant dense<0.000000e+00> : vector<128xf32>
      %17 = vector.multi_reduction <add>, %16, %cst_14 [0] : vector<256x128xf32> to vector<128xf32>
      %18 = vector.shape_cast %17 : vector<128xf32> to vector<1x128xf32>
      %19 = tpu.iota {dimensions = array<i32: 0>} : vector<8x128xi32>
      %c0_i32_15 = arith.constant 0 : i32
      %20 = vector.broadcast %c0_i32_15 : i32 to vector<8x128xi32>
      %21 = arith.cmpi eq, %19, %20 : vector<8x128xi32>
      %c1_i32_16 = arith.constant 1 : i32
      %22 = vector.broadcast %c1_i32_16 : i32 to vector<8x128xi32>
      %23 = arith.cmpi eq, %19, %22 : vector<8x128xi32>
      %cst_17 = arith.constant 0.000000e+00 : f32
      %24 = vector.shape_cast %18 : vector<1x128xf32> to vector<1x128xf32>
      %25 = vector.broadcast %24 : vector<1x128xf32> to vector<8x128xf32>
      %26 = vector.broadcast %cst_17 : f32 to vector<8x128xf32>
      %27 = arith.select %23, %25, %26 : vector<8x128xi1>, vector<8x128xf32>
      %28 = vector.shape_cast %15 : vector<1x128xf32> to vector<1x128xf32>
      %29 = vector.broadcast %28 : vector<1x128xf32> to vector<8x128xf32>
      %30 = arith.select %21, %29, %27 : vector<8x128xi1>, vector<8x128xf32>
      %c0_18 = arith.constant 0 : index
      %c0_19 = arith.constant 0 : index
      %31 = vector.load %arg5[%c0_18, %c0_19] : memref<8x128xf32, #tpu.memory_space<vmem>>, vector<8x128xf32>
      tpu.vector_store %arg5[%c0_18, %c0_19], %30 {strides = array<i32>} : memref<8x128xf32, #tpu.memory_space<vmem>>, vector<8x128xf32>,
    } else {
    }
    return
  }
  func.func @transform_0(%arg0: i32, %arg1: i32) -> (i32, i32) {
    %c0_i32 = arith.constant 0 : i32
    return %arg0, %arg1 : i32, i32
  }
  func.func @transform_1(%arg0: i32, %arg1: i32) -> (i32, i32) {
    %c0_i32 = arith.constant 0 : i32
    %c0_i32_0 = arith.constant 0 : i32
    return %arg1, %c0_i32 : i32, i32
  }
  func.func @transform_2(%arg0: i32, %arg1: i32) -> (i32, i32) {
    %c0_i32 = arith.constant 0 : i32
    %c0_i32_0 = arith.constant 0 : i32
    return %arg0, %c0_i32 : i32, i32
  }
  func.func @transform_3(%arg0: i32, %arg1: i32) -> (i32, i32) {
    %c0_i32 = arith.constant 0 : i32
    %c0_i32_0 = arith.constant 0 : i32
    return %arg0, %c0_i32 : i32, i32
  }
}

module attributes {stable_mosaic.version = 11 : i64} {
  func.func @_affine_relu_kernel(%arg0: i32, %arg1: memref<256x128xf32, #tpu.memory_space<vmem>>, %arg2: memref<1x128xf32, #tpu.memory_space<vmem>>, %arg3: memref<1x128xf32, #tpu.memory_space<vmem>>, %arg4: memref<1x128xf32, #tpu.memory_space<vmem>>, %arg5: memref<256x128xbf16, #tpu.memory_space<vmem>>) attributes {dimension_semantics = [#tpu.dimension_semantics<parallel>], iteration_bounds = array<i64: 2>, scalar_prefetch = 0 : i64, scratch_operands = 0 : i64, tpu.core_type = #tpu.core_type<tc>, window_params = [{transform_indices = @transform_0, window_bounds = array<i64: 256, 128>}, {pipeline_mode = #tpu.pipeline_mode<synchronous>, transform_indices = @transform_1, window_bounds = array<i64: 1, 128>}, {pipeline_mode = #tpu.pipeline_mode<synchronous>, transform_indices = @transform_2, window_bounds = array<i64: 1, 128>}, {pipeline_mode = #tpu.pipeline_mode<synchronous>, transform_indices = @transform_3, window_bounds = array<i64: 1, 128>}, {transform_indices = @transform_4, window_bounds = array<i64: 256, 128>}]} {
    %c0 = arith.constant 0 : index
    %c0_0 = arith.constant 0 : index
    %0 = vector.load %arg1[%c0, %c0_0] : memref<256x128xf32, #tpu.memory_space<vmem>>, vector<256x128xf32>
    %c0_1 = arith.constant 0 : index
    %c0_2 = arith.constant 0 : index
    %1 = vector.load %arg2[%c0_1, %c0_2] : memref<1x128xf32, #tpu.memory_space<vmem>>, vector<1x128xf32>
    %2 = vector.broadcast %1 : vector<1x128xf32> to vector<256x128xf32>
    %3 = arith.mulf %0, %2 : vector<256x128xf32>
    %c0_3 = arith.constant 0 : index
    %c0_4 = arith.constant 0 : index
    %4 = vector.load %arg3[%c0_3, %c0_4] : memref<1x128xf32, #tpu.memory_space<vmem>>, vector<1x128xf32>
    %5 = vector.broadcast %4 : vector<1x128xf32> to vector<256x128xf32>
    %6 = arith.addf %3, %5 : vector<256x128xf32>
    %cst = arith.constant 0.000000e+00 : f32
    %7 = vector.broadcast %cst : f32 to vector<256x128xf32>
    %8 = arith.maximumf %6, %7 : vector<256x128xf32>
    %c0_5 = arith.constant 0 : index
    %c0_6 = arith.constant 0 : index
    %9 = vector.load %arg4[%c0_5, %c0_6] : memref<1x128xf32, #tpu.memory_space<vmem>>, vector<1x128xf32>
    %10 = vector.broadcast %9 : vector<1x128xf32> to vector<256x128xf32>
    %11 = arith.addf %8, %10 : vector<256x128xf32>
    %12 = arith.truncf %11 : vector<256x128xf32> to vector<256x128xbf16>
    %c0_7 = arith.constant 0 : index
    %c0_8 = arith.constant 0 : index
    %13 = vector.load %arg5[%c0_7, %c0_8] : memref<256x128xbf16, #tpu.memory_space<vmem>>, vector<256x128xbf16>
    tpu.vector_store %arg5[%c0_7, %c0_8], %12 {strides = array<i32>} : memref<256x128xbf16, #tpu.memory_space<vmem>>, vector<256x128xbf16>,
    return
  }
  func.func @transform_0(%arg0: i32) -> (i32, i32) {
    %c0_i32 = arith.constant 0 : i32
    %c0_i32_0 = arith.constant 0 : i32
    return %arg0, %c0_i32 : i32, i32
  }
  func.func @transform_1(%arg0: i32) -> (i32, i32) {
    %c0_i32 = arith.constant 0 : i32
    %c0_i32_0 = arith.constant 0 : i32
    %c0_i32_1 = arith.constant 0 : i32
    return %c0_i32, %c0_i32_0 : i32, i32
  }
  func.func @transform_2(%arg0: i32) -> (i32, i32) {
    %c0_i32 = arith.constant 0 : i32
    %c0_i32_0 = arith.constant 0 : i32
    %c0_i32_1 = arith.constant 0 : i32
    return %c0_i32, %c0_i32_0 : i32, i32
  }
  func.func @transform_3(%arg0: i32) -> (i32, i32) {
    %c0_i32 = arith.constant 0 : i32
    %c0_i32_0 = arith.constant 0 : i32
    %c0_i32_1 = arith.constant 0 : i32
    return %c0_i32, %c0_i32_0 : i32, i32
  }
  func.func @transform_4(%arg0: i32) -> (i32, i32) {
    %c0_i32 = arith.constant 0 : i32
    %c0_i32_0 = arith.constant 0 : i32
    return %arg0, %c0_i32 : i32, i32
  }
}

module attributes {stable_mosaic.version = 11 : i64} {
  func.func @_conv_bn_stats_kernel(%arg0: i32, %arg1: i32, %arg2: memref<256x128xbf16, #tpu.memory_space<vmem>>, %arg3: memref<128x128xbf16, #tpu.memory_space<vmem>>, %arg4: memref<256x128xf32, #tpu.memory_space<vmem>>, %arg5: memref<8x128xf32, #tpu.memory_space<vmem>>, %arg6: memref<256x128xf32, #tpu.memory_space<vmem>>) attributes {dimension_semantics = [#tpu.dimension_semantics<parallel>, #tpu.dimension_semantics<arbitrary>], iteration_bounds = array<i64: 2, 3>, scalar_prefetch = 0 : i64, scratch_operands = 1 : i64, tpu.core_type = #tpu.core_type<tc>, window_params = [{transform_indices = @transform_0, window_bounds = array<i64: 256, 128>}, {transform_indices = @transform_1, window_bounds = array<i64: 128, 128>}, {transform_indices = @transform_2, window_bounds = array<i64: 256, 128>}, {transform_indices = @transform_3, window_bounds = array<i64: 8, 128>}]} {
    %c0_i32 = arith.constant 0 : i32
    %0 = arith.cmpi eq, %arg1, %c0_i32 : i32
    %1 = arith.extui %0 : i1 to i32
    %c0_i32_0 = arith.constant 0 : i32
    %2 = arith.cmpi ne, %1, %c0_i32_0 : i32
    scf.if %2 {
      %cst_9 = arith.constant 0.000000e+00 : f32
      %12 = vector.broadcast %cst_9 : f32 to vector<256x128xf32>
      %c0_10 = arith.constant 0 : index
      %c0_11 = arith.constant 0 : index
      %13 = vector.load %arg6[%c0_10, %c0_11] : memref<256x128xf32, #tpu.memory_space<vmem>>, vector<256x128xf32>
      tpu.vector_store %arg6[%c0_10, %c0_11], %12 {strides = array<i32>} : memref<256x128xf32, #tpu.memory_space<vmem>>, vector<256x128xf32>,
    } else {
    }
    %c0 = arith.constant 0 : index
    %c0_1 = arith.constant 0 : index
    %3 = vector.load %arg6[%c0, %c0_1] : memref<256x128xf32, #tpu.memory_space<vmem>>, vector<256x128xf32>
    %c0_2 = arith.constant 0 : index
    %c0_3 = arith.constant 0 : index
    %4 = vector.load %arg2[%c0_2, %c0_3] : memref<256x128xbf16, #tpu.memory_space<vmem>>, vector<256x128xbf16>
    %c0_4 = arith.constant 0 : index
    %c0_5 = arith.constant 0 : index
    %5 = vector.load %arg3[%c0_4, %c0_5] : memref<128x128xbf16, #tpu.memory_space<vmem>>, vector<128x128xbf16>
    %cst = arith.constant dense<0.000000e+00> : vector<256x128xf32>
    %6 = tpu.matmul %4, %5, %cst {dimension_numbers = #tpu.dot_dimension_numbers<[1], [0], [0], [1], [0, 0, 1, 1], [], []>} : vector<256x128xbf16>, vector<128x128xbf16>, vector<256x128xf32> -> vector<256x128xf32>
    %7 = arith.addf %3, %6 : vector<256x128xf32>
    %c0_6 = arith.constant 0 : index
    %c0_7 = arith.constant 0 : index
    %8 = vector.load %arg6[%c0_6, %c0_7] : memref<256x128xf32, #tpu.memory_space<vmem>>, vector<256x128xf32>
    tpu.vector_store %arg6[%c0_6, %c0_7], %7 {strides = array<i32>} : memref<256x128xf32, #tpu.memory_space<vmem>>, vector<256x128xf32>,
    %c2_i32 = arith.constant 2 : i32
    %9 = arith.cmpi eq, %arg1, %c2_i32 : i32
    %10 = arith.extui %9 : i1 to i32
    %c0_i32_8 = arith.constant 0 : i32
    %11 = arith.cmpi ne, %10, %c0_i32_8 : i32
    scf.if %11 {
      %c0_9 = arith.constant 0 : index
      %c0_10 = arith.constant 0 : index
      %12 = vector.load %arg6[%c0_9, %c0_10] : memref<256x128xf32, #tpu.memory_space<vmem>>, vector<256x128xf32>
      %c0_11 = arith.constant 0 : index
      %c0_12 = arith.constant 0 : index
      %13 = vector.load %arg4[%c0_11, %c0_12] : memref<256x128xf32, #tpu.memory_space<vmem>>, vector<256x128xf32>
      tpu.vector_store %arg4[%c0_11, %c0_12], %12 {strides = array<i32>} : memref<256x128xf32, #tpu.memory_space<vmem>>, vector<256x128xf32>,
      %cst_13 = arith.constant dense<0.000000e+00> : vector<128xf32>
      %14 = vector.multi_reduction <add>, %12, %cst_13 [0] : vector<256x128xf32> to vector<128xf32>
      %15 = vector.shape_cast %14 : vector<128xf32> to vector<1x128xf32>
      %16 = arith.mulf %12, %12 : vector<256x128xf32>
      %cst_14 = arith.constant dense<0.000000e+00> : vector<128xf32>
      %17 = vector.multi_reduction <add>, %16, %cst_14 [0] : vector<256x128xf32> to vector<128xf32>
      %18 = vector.shape_cast %17 : vector<128xf32> to vector<1x128xf32>
      %19 = tpu.iota {dimensions = array<i32: 0>} : vector<8x128xi32>
      %c0_i32_15 = arith.constant 0 : i32
      %20 = vector.broadcast %c0_i32_15 : i32 to vector<8x128xi32>
      %21 = arith.cmpi eq, %19, %20 : vector<8x128xi32>
      %c1_i32 = arith.constant 1 : i32
      %22 = vector.broadcast %c1_i32 : i32 to vector<8x128xi32>
      %23 = arith.cmpi eq, %19, %22 : vector<8x128xi32>
      %cst_16 = arith.constant 0.000000e+00 : f32
      %24 = vector.shape_cast %18 : vector<1x128xf32> to vector<1x128xf32>
      %25 = vector.broadcast %24 : vector<1x128xf32> to vector<8x128xf32>
      %26 = vector.broadcast %cst_16 : f32 to vector<8x128xf32>
      %27 = arith.select %23, %25, %26 : vector<8x128xi1>, vector<8x128xf32>
      %28 = vector.shape_cast %15 : vector<1x128xf32> to vector<1x128xf32>
      %29 = vector.broadcast %28 : vector<1x128xf32> to vector<8x128xf32>
      %30 = arith.select %21, %29, %27 : vector<8x128xi1>, vector<8x128xf32>
      %c0_17 = arith.constant 0 : index
      %c0_18 = arith.constant 0 : index
      %31 = vector.load %arg5[%c0_17, %c0_18] : memref<8x128xf32, #tpu.memory_space<vmem>>, vector<8x128xf32>
      tpu.vector_store %arg5[%c0_17, %c0_18], %30 {strides = array<i32>} : memref<8x128xf32, #tpu.memory_space<vmem>>, vector<8x128xf32>,
    } else {
    }
    return
  }
  func.func @transform_0(%arg0: i32, %arg1: i32) -> (i32, i32) {
    %c0_i32 = arith.constant 0 : i32
    return %arg0, %arg1 : i32, i32
  }
  func.func @transform_1(%arg0: i32, %arg1: i32) -> (i32, i32) {
    %c0_i32 = arith.constant 0 : i32
    %c0_i32_0 = arith.constant 0 : i32
    return %arg1, %c0_i32 : i32, i32
  }
  func.func @transform_2(%arg0: i32, %arg1: i32) -> (i32, i32) {
    %c0_i32 = arith.constant 0 : i32
    %c0_i32_0 = arith.constant 0 : i32
    return %arg0, %c0_i32 : i32, i32
  }
  func.func @transform_3(%arg0: i32, %arg1: i32) -> (i32, i32) {
    %c0_i32 = arith.constant 0 : i32
    %c0_i32_0 = arith.constant 0 : i32
    return %arg0, %c0_i32 : i32, i32
  }
}

module attributes {stable_mosaic.version = 11 : i64} {
  func.func @_affine_relu_kernel(%arg0: i32, %arg1: memref<256x128xf32, #tpu.memory_space<vmem>>, %arg2: memref<1x128xf32, #tpu.memory_space<vmem>>, %arg3: memref<1x128xf32, #tpu.memory_space<vmem>>, %arg4: memref<1x128xf32, #tpu.memory_space<vmem>>, %arg5: memref<256x128xf32, #tpu.memory_space<vmem>>) attributes {dimension_semantics = [#tpu.dimension_semantics<parallel>], iteration_bounds = array<i64: 2>, scalar_prefetch = 0 : i64, scratch_operands = 0 : i64, tpu.core_type = #tpu.core_type<tc>, window_params = [{transform_indices = @transform_0, window_bounds = array<i64: 256, 128>}, {pipeline_mode = #tpu.pipeline_mode<synchronous>, transform_indices = @transform_1, window_bounds = array<i64: 1, 128>}, {pipeline_mode = #tpu.pipeline_mode<synchronous>, transform_indices = @transform_2, window_bounds = array<i64: 1, 128>}, {pipeline_mode = #tpu.pipeline_mode<synchronous>, transform_indices = @transform_3, window_bounds = array<i64: 1, 128>}, {transform_indices = @transform_4, window_bounds = array<i64: 256, 128>}]} {
    %c0 = arith.constant 0 : index
    %c0_0 = arith.constant 0 : index
    %0 = vector.load %arg1[%c0, %c0_0] : memref<256x128xf32, #tpu.memory_space<vmem>>, vector<256x128xf32>
    %c0_1 = arith.constant 0 : index
    %c0_2 = arith.constant 0 : index
    %1 = vector.load %arg2[%c0_1, %c0_2] : memref<1x128xf32, #tpu.memory_space<vmem>>, vector<1x128xf32>
    %2 = vector.broadcast %1 : vector<1x128xf32> to vector<256x128xf32>
    %3 = arith.mulf %0, %2 : vector<256x128xf32>
    %c0_3 = arith.constant 0 : index
    %c0_4 = arith.constant 0 : index
    %4 = vector.load %arg3[%c0_3, %c0_4] : memref<1x128xf32, #tpu.memory_space<vmem>>, vector<1x128xf32>
    %5 = vector.broadcast %4 : vector<1x128xf32> to vector<256x128xf32>
    %6 = arith.addf %3, %5 : vector<256x128xf32>
    %cst = arith.constant 0.000000e+00 : f32
    %7 = vector.broadcast %cst : f32 to vector<256x128xf32>
    %8 = arith.maximumf %6, %7 : vector<256x128xf32>
    %c0_5 = arith.constant 0 : index
    %c0_6 = arith.constant 0 : index
    %9 = vector.load %arg4[%c0_5, %c0_6] : memref<1x128xf32, #tpu.memory_space<vmem>>, vector<1x128xf32>
    %10 = vector.broadcast %9 : vector<1x128xf32> to vector<256x128xf32>
    %11 = arith.addf %8, %10 : vector<256x128xf32>
    %c0_7 = arith.constant 0 : index
    %c0_8 = arith.constant 0 : index
    %12 = vector.load %arg5[%c0_7, %c0_8] : memref<256x128xf32, #tpu.memory_space<vmem>>, vector<256x128xf32>
    tpu.vector_store %arg5[%c0_7, %c0_8], %11 {strides = array<i32>} : memref<256x128xf32, #tpu.memory_space<vmem>>, vector<256x128xf32>,
    return
  }
  func.func @transform_0(%arg0: i32) -> (i32, i32) {
    %c0_i32 = arith.constant 0 : i32
    %c0_i32_0 = arith.constant 0 : i32
    return %arg0, %c0_i32 : i32, i32
  }
  func.func @transform_1(%arg0: i32) -> (i32, i32) {
    %c0_i32 = arith.constant 0 : i32
    %c0_i32_0 = arith.constant 0 : i32
    %c0_i32_1 = arith.constant 0 : i32
    return %c0_i32, %c0_i32_0 : i32, i32
  }
  func.func @transform_2(%arg0: i32) -> (i32, i32) {
    %c0_i32 = arith.constant 0 : i32
    %c0_i32_0 = arith.constant 0 : i32
    %c0_i32_1 = arith.constant 0 : i32
    return %c0_i32, %c0_i32_0 : i32, i32
  }
  func.func @transform_3(%arg0: i32) -> (i32, i32) {
    %c0_i32 = arith.constant 0 : i32
    %c0_i32_0 = arith.constant 0 : i32
    %c0_i32_1 = arith.constant 0 : i32
    return %c0_i32, %c0_i32_0 : i32, i32
  }
  func.func @transform_4(%arg0: i32) -> (i32, i32) {
    %c0_i32 = arith.constant 0 : i32
    %c0_i32_0 = arith.constant 0 : i32
    return %arg0, %c0_i32 : i32, i32
  }
}

</mosaic_0001>

<bundles_post_ra>
// kernel: down_forward.5
= control target key start
LH: loop header
LB: loop body
LE: loop exit
PB: predicated region body
PF: predicated region fallthrough
CT: control target
= control target key end

     0   :  { %s643_s15 = smov 0   ;;  %s827_s0 = inlined_call_operand.vmem [shape: f32[512,128], index: 0, kind: input, shape index: {}]   ;;  %s828_s1 = inlined_call_operand.vmem [shape: f32[1,128], index: 1, kind: input, shape index: {}]   ;;  %s829_s2 = inlined_call_operand.vmem [shape: f32[1,128], index: 2, kind: input, shape index: {}]   ;;  %s830_s3 = inlined_call_operand.vmem [shape: f32[1,128], index: 3, kind: input, shape index: {}]   ;;  %s831_s4 = inlined_call_operand.vmem [shape: bf16[512,128], index: 4, kind: output, shape index: {}]  }
   0x1 LB: > { %s493_s16 = sadd.s32 4294967295, %s616_s15   ;;  %p497_p0 = scmp.ge.s32.totalorder %s616_s15, 1  ;;  %s616_s15 = sphi %s643_s15, %s14_s15  }
   0x2   : > { %p163_p1 = scmp.lt.s32.totalorder %s616_s15, 3 }
   0x4   : > { %p164_p2 = pnand %p497_p0, %p163_p1 }
   0x5   : > { %s498_s17 = sshll.u32 (!%p164_p2), %s493_s16, 5 }
   0x6   : > { %167 = sbr.rel (%p164_p2) target bundleno = 58 (0x3a), region = 36  ;;  %p190_p3 = scmp.lt.s32.totalorder (!%p164_p2), %s498_s17, 63 }
   0xb   : > { %s833_s17 = smov (!%p190_p3, %s498_s17), 63  ;;  %v656_v0 = vld [vmem:[%s828_s1] ss:$0 sm:$0xff] }
   0xc   : > { %s499_s20 = sshll.u32 %s833_s17, 3  ;;  %v667_v1 = vld [vmem:[%s829_s2] ss:$0 sm:$0xff]  ;;  %s501_s28 = sshll.u32 %s833_s17, 2 }
   0xd   : > { %s662_s23 = scalar_lea.vmem %s827_s0, %s499_s20  ;;  %v688_v18 = vld [vmem:[%s830_s3] ss:$0 sm:$0xff]  ;;  %s708_s5 = scalar_lea.vmem %s831_s4, %s501_s28 }
   0xe   : > { %v201_v2 = vld [vmem:[%s662_s23] sm:$0xff]  ;;  %v202_v3 = vld [vmem:[%s662_s23 + $0x8] sm:$0xff]  ;;  %v203_v4 = vld [vmem:[%s662_s23 + $0x10] sm:$0xff] }
   0xf   : > { %v237_v5 = vmul.f32 %v656_v0, %v201_v2  ;;  %v238_v6 = vmul.f32 %v656_v0, %v202_v3  ;;  %v204_v7 = vld [vmem:[%s662_s23 + $0x18] sm:$0xff]  ;;  %v239_v8 = vmul.f32 %v656_v0, %v203_v4  ;;  %v205_v9 = vld [vmem:[%s662_s23 + $0x20] sm:$0xff]  ;;  %v206_v10 = vld [vmem:[%s662_s23 + $0x28] sm:$0xff] }
  0x10   : > { %v240_v11 = vmul.f32 %v656_v0, %v204_v7  ;;  %v241_v12 = vmul.f32 %v656_v0, %v205_v9  ;;  %v242_v13 = vmul.f32 %v656_v0, %v206_v10  ;;  %v207_v14 = vld [vmem:[%s662_s23 + $0x30] sm:$0xff]  ;;  %v208_v15 = vld [vmem:[%s662_s23 + $0x38] sm:$0xff]  ;;  %v209_v33 = vld [vmem:[%s662_s23 + $0x40] sm:$0xff] }
  0x11   : > { %v273_v16 = vadd.f32 %v667_v1, %v237_v5  ;;  %v274_v17 = vadd.f32 %v667_v1, %v238_v6  ;;  %v275_v19 = vadd.f32 %v667_v1, %v239_v8  ;;  %v243_v20 = vmul.f32 %v656_v0, %v207_v14  ;;  %v210_v34 = vld [vmem:[%s662_s23 + $0x48] sm:$0xff]  ;;  %v211_v39 = vld [vmem:[%s662_s23 + $0x50] sm:$0xff]  ;;  %v212_v44 = vld [vmem:[%s662_s23 + $0x58] sm:$0xff] }
  0x12   : > { %v276_v21 = vadd.f32 %v667_v1, %v240_v11  ;;  %v277_v22 = vadd.f32 %v667_v1, %v241_v12  ;;  %v278_v23 = vadd.f32 %v667_v1, %v242_v13  ;;  %v244_v24 = vmul.f32 %v656_v0, %v208_v15  ;;  %v213_v45 = vld [vmem:[%s662_s23 + $0x60] sm:$0xff]  ;;  %v214_v50 = vld [vmem:[%s662_s23 + $0x68] sm:$0xff]  ;;  %v215_v51 = vld [vmem:[%s662_s23 + $0x70] sm:$0xff] }
  0x13   : > { %v305_v25 = vmax.f32 %v273_v16, 0.0  ;;  %v306_v26 = vmax.f32 %v274_v17, 0.0  ;;  %v307_v27 = vmax.f32 %v275_v19, 0.0  ;;  %v279_v28 = vadd.f32 %v667_v1, %v243_v20  ;;  %v216_v60 = vld [vmem:[%s662_s23 + $0x78] sm:$0xff]  ;;  %v217_v11 = vld [vmem:[%s662_s23 + $0x80] sm:$0xff]  ;;  %v218_v16 = vld [vmem:[%s662_s23 + $0x88] sm:$0xff] }
  0x14   : > { %v308_v29 = vmax.f32 %v276_v21, 0.0  ;;  %v309_v30 = vmax.f32 %v277_v22, 0.0  ;;  %v310_v31 = vmax.f32 %v278_v23, 0.0  ;;  %v280_v32 = vadd.f32 %v667_v1, %v244_v24  ;;  %v219_v22 = vld [vmem:[%s662_s23 + $0x90] sm:$0xff]  ;;  %v220_v23 = vld [vmem:[%s662_s23 + $0x98] sm:$0xff] }
  0x15   : > { %v341_v35 = vadd.f32 %v688_v18, %v305_v25  ;;  %v342_v36 = vadd.f32 %v688_v18, %v306_v26  ;;  %v343_v37 = vadd.f32 %v688_v18, %v307_v27  ;;  %v311_v38 = vmax.f32 %v279_v28, 0.0  ;;  %v221_v28 = vld [vmem:[%s662_s23 + $0xa0] sm:$0xff] }
  0x16   : > { %v344_v40 = vadd.f32 %v688_v18, %v308_v29  ;;  %v345_v41 = vadd.f32 %v688_v18, %v309_v30  ;;  %v346_v42 = vadd.f32 %v688_v18, %v310_v31  ;;  %v312_v43 = vmax.f32 %v280_v32, 0.0 }
  0x17   : > { %v507_v46 = vpack.c.bf16 %v342_v36, %v341_v35  ;;  %v347_v47 = vadd.f32 %v688_v18, %v311_v38  ;;  %v245_v48 = vmul.f32 %v656_v0, %v209_v33  ;;  %v246_v49 = vmul.f32 %v656_v0, %v210_v34  ;;  %v222_v33 = vld [vmem:[%s662_s23 + $0xa8] sm:$0xff]  ;;  %v223_v38 = vld [vmem:[%s662_s23 + $0xb0] sm:$0xff] }
  0x18   : > { %v512_v52 = vpack.c.bf16 %v344_v40, %v343_v37  ;;  %v517_v53 = vpack.c.bf16 %v346_v42, %v345_v41  ;;  %v348_v54 = vadd.f32 %v688_v18, %v312_v43  ;;  %v247_v55 = vmul.f32 %v656_v0, %v211_v39 }
  0x19   : > { %508 = vst [vmem:[%s708_s5] sm:$0xff] %v507_v46   ;;  %v281_v56 = vadd.f32 %v667_v1, %v245_v48  ;;  %v282_v57 = vadd.f32 %v667_v1, %v246_v49  ;;  %v248_v58 = vmul.f32 %v656_v0, %v212_v44  ;;  %v249_v59 = vmul.f32 %v656_v0, %v213_v45 }
  0x1a   : > { %584 = vst [vmem:[%s708_s5 + $0x8] sm:$0xff] %v512_v52   ;;  %v522_v61 = vpack.c.bf16 %v348_v54, %v347_v47  ;;  %v283_v62 = vadd.f32 %v667_v1, %v247_v55  ;;  %v250_v63 = vmul.f32 %v656_v0, %v214_v50  ;;  %v251_v2 = vmul.f32 %v656_v0, %v215_v51  ;;  %v224_v47 = vld [vmem:[%s662_s23 + $0xb8] sm:$0xff]  ;;  %v225_v52 = vld [vmem:[%s662_s23 + $0xc0] sm:$0xff] }
  0x1b   : > { %585 = vst [vmem:[%s708_s5 + $0x10] sm:$0xff] %v517_v53   ;;  %v313_v3 = vmax.f32 %v281_v56, 0.0  ;;  %v314_v4 = vmax.f32 %v282_v57, 0.0  ;;  %v284_v5 = vadd.f32 %v667_v1, %v248_v58  ;;  %v285_v6 = vadd.f32 %v667_v1, %v249_v59 }
  0x1c   : > { %586 = vst [vmem:[%s708_s5 + $0x18] sm:$0xff] %v522_v61   ;;  %v315_v7 = vmax.f32 %v283_v62, 0.0  ;;  %v286_v8 = vadd.f32 %v667_v1, %v250_v63  ;;  %v252_v9 = vmul.f32 %v656_v0, %v216_v60  ;;  %v287_v10 = vadd.f32 %v667_v1, %v251_v2  ;;  %v226_v61 = vld [vmem:[%s662_s23 + $0xc8] sm:$0xff] }
  0x1d   : > { %v349_v12 = vadd.f32 %v688_v18, %v313_v3  ;;  %v350_v13 = vadd.f32 %v688_v18, %v314_v4  ;;  %v316_v14 = vmax.f32 %v284_v5, 0.0  ;;  %v317_v15 = vmax.f32 %v285_v6, 0.0  ;;  %v227_v4 = vld [vmem:[%s662_s23 + $0xd0] sm:$0xff]  ;;  %v228_v5 = vld [vmem:[%s662_s23 + $0xd8] sm:$0xff] }
  0x1e   : > { %v351_v17 = vadd.f32 %v688_v18, %v315_v7  ;;  %v318_v19 = vmax.f32 %v286_v8, 0.0  ;;  %v288_v20 = vadd.f32 %v667_v1, %v252_v9  ;;  %v319_v21 = vmax.f32 %v287_v10, 0.0  ;;  %v229_v10 = vld [vmem:[%s662_s23 + $0xe0] sm:$0xff] }
  0x1f   : > { %v527_v24 = vpack.c.bf16 %v350_v13, %v349_v12  ;;  %v352_v25 = vadd.f32 %v688_v18, %v316_v14  ;;  %v353_v26 = vadd.f32 %v688_v18, %v317_v15  ;;  %v253_v27 = vmul.f32 %v656_v0, %v217_v11  ;;  %v230_v15 = vld [vmem:[%s662_s23 + $0xe8] sm:$0xff] }
  0x20   : > { %v354_v29 = vadd.f32 %v688_v18, %v318_v19  ;;  %v320_v30 = vmax.f32 %v288_v20, 0.0  ;;  %v355_v31 = vadd.f32 %v688_v18, %v319_v21  ;;  %v254_v32 = vmul.f32 %v656_v0, %v218_v16  ;;  %v231_v21 = vld [vmem:[%s662_s23 + $0xf0] sm:$0xff] }
  0x21   : > { %587 = vst [vmem:[%s708_s5 + $0x20] sm:$0xff] %v527_v24   ;;  %v532_v34 = vpack.c.bf16 %v352_v25, %v351_v17  ;;  %v289_v35 = vadd.f32 %v667_v1, %v253_v27  ;;  %v255_v36 = vmul.f32 %v656_v0, %v219_v22  ;;  %v256_v37 = vmul.f32 %v656_v0, %v220_v23 }
  0x22   : > { %v537_v39 = vpack.c.bf16 %v354_v29, %v353_v26  ;;  %v356_v40 = vadd.f32 %v688_v18, %v320_v30  ;;  %v290_v41 = vadd.f32 %v667_v1, %v254_v32  ;;  %v257_v42 = vmul.f32 %v656_v0, %v221_v28  ;;  %v232_v30 = vld [vmem:[%s662_s23 + $0xf8] sm:$0xff] }
  0x23   : > { %588 = vst [vmem:[%s708_s5 + $0x28] sm:$0xff] %v532_v34   ;;  %v321_v43 = vmax.f32 %v289_v35, 0.0  ;;  %v291_v44 = vadd.f32 %v667_v1, %v255_v36  ;;  %v292_v45 = vadd.f32 %v667_v1, %v256_v37  ;;  %v258_v46 = vmul.f32 %v656_v0, %v222_v33 }
  0x24   : > { %589 = vst [vmem:[%s708_s5 + $0x30] sm:$0xff] %v537_v39   ;;  %v542_v48 = vpack.c.bf16 %v356_v40, %v355_v31  ;;  %v322_v49 = vmax.f32 %v290_v41, 0.0  ;;  %v293_v50 = vadd.f32 %v667_v1, %v257_v42  ;;  %v259_v51 = vmul.f32 %v656_v0, %v223_v38 }
  0x25   : > { %v357_v53 = vadd.f32 %v688_v18, %v321_v43  ;;  %v323_v54 = vmax.f32 %v291_v44, 0.0  ;;  %v324_v55 = vmax.f32 %v292_v45, 0.0  ;;  %v294_v56 = vadd.f32 %v667_v1, %v258_v46 }
  0x26   : > { %590 = vst [vmem:[%s708_s5 + $0x38] sm:$0xff] %v542_v48   ;;  %v358_v57 = vadd.f32 %v688_v18, %v322_v49  ;;  %v325_v58 = vmax.f32 %v293_v50, 0.0  ;;  %v260_v59 = vmul.f32 %v656_v0, %v224_v47  ;;  %v295_v60 = vadd.f32 %v667_v1, %v259_v51 }
  0x27   : > { %v359_v62 = vadd.f32 %v688_v18, %v323_v54  ;;  %v360_v63 = vadd.f32 %v688_v18, %v324_v55  ;;  %v326_v2 = vmax.f32 %v294_v56, 0.0  ;;  %v261_v3 = vmul.f32 %v656_v0, %v225_v52 }
  0x28   : > { %v547_v6 = vpack.c.bf16 %v358_v57, %v357_v53  ;;  %v361_v7 = vadd.f32 %v688_v18, %v325_v58  ;;  %v296_v8 = vadd.f32 %v667_v1, %v260_v59  ;;  %v327_v9 = vmax.f32 %v295_v60, 0.0 }
  0x29   : > { %v552_v11 = vpack.c.bf16 %v360_v63, %v359_v62  ;;  %v362_v12 = vadd.f32 %v688_v18, %v326_v2  ;;  %v262_v13 = vmul.f32 %v656_v0, %v226_v61  ;;  %v297_v14 = vadd.f32 %v667_v1, %v261_v3 }
  0x2a   : > { %591 = vst [vmem:[%s708_s5 + $0x40] sm:$0xff] %v547_v6   ;;  %v328_v16 = vmax.f32 %v296_v8, 0.0  ;;  %v363_v17 = vadd.f32 %v688_v18, %v327_v9  ;;  %v263_v19 = vmul.f32 %v656_v0, %v227_v4  ;;  %v264_v20 = vmul.f32 %v656_v0, %v228_v5 }
  0x2b   : > { %592 = vst [vmem:[%s708_s5 + $0x48] sm:$0xff] %v552_v11   ;;  %v557_v22 = vpack.c.bf16 %v362_v12, %v361_v7  ;;  %v298_v23 = vadd.f32 %v667_v1, %v262_v13  ;;  %v329_v24 = vmax.f32 %v297_v14, 0.0  ;;  %v265_v25 = vmul.f32 %v656_v0, %v229_v10 }
  0x2c   : > { %v364_v26 = vadd.f32 %v688_v18, %v328_v16  ;;  %v299_v27 = vadd.f32 %v667_v1, %v263_v19  ;;  %v300_v28 = vadd.f32 %v667_v1, %v264_v20  ;;  %v266_v29 = vmul.f32 %v656_v0, %v230_v15 }
  0x2d   : > { %593 = vst [vmem:[%s708_s5 + $0x50] sm:$0xff] %v557_v22   ;;  %v330_v31 = vmax.f32 %v298_v23, 0.0  ;;  %v365_v32 = vadd.f32 %v688_v18, %v329_v24  ;;  %v301_v33 = vadd.f32 %v667_v1, %v265_v25  ;;  %v267_v34 = vmul.f32 %v656_v0, %v231_v21 }
  0x2e   : > { %v562_v35 = vpack.c.bf16 %v364_v26, %v363_v17  ;;  %v331_v36 = vmax.f32 %v299_v27, 0.0  ;;  %v332_v37 = vmax.f32 %v300_v28, 0.0  ;;  %v302_v38 = vadd.f32 %v667_v1, %v266_v29 }
  0x2f   : > { %v366_v39 = vadd.f32 %v688_v18, %v330_v31  ;;  %v333_v40 = vmax.f32 %v301_v33, 0.0  ;;  %v268_v41 = vmul.f32 %v656_v0, %v232_v30  ;;  %v303_v42 = vadd.f32 %v667_v1, %v267_v34 }
  0x30   : > { %594 = vst [vmem:[%s708_s5 + $0x58] sm:$0xff] %v562_v35   ;;  %v367_v43 = vadd.f32 %v688_v18, %v331_v36  ;;  %v368_v44 = vadd.f32 %v688_v18, %v332_v37  ;;  %v334_v45 = vmax.f32 %v302_v38, 0.0 }
  0x31   : > { %v567_v46 = vpack.c.bf16 %v366_v39, %v365_v32  ;;  %v369_v47 = vadd.f32 %v688_v18, %v333_v40  ;;  %v304_v48 = vadd.f32 %v667_v1, %v268_v41  ;;  %v335_v49 = vmax.f32 %v303_v42, 0.0 }
  0x32   : > { %v572_v50 = vpack.c.bf16 %v368_v44, %v367_v43  ;;  %v370_v51 = vadd.f32 %v688_v18, %v334_v45 }
  0x33   : > { %595 = vst [vmem:[%s708_s5 + $0x60] sm:$0xff] %v567_v46   ;;  %v336_v0 = vmax.f32 %v304_v48, 0.0  ;;  %v371_v52 = vadd.f32 %v688_v18, %v335_v49 }
  0x34   : > { %596 = vst [vmem:[%s708_s5 + $0x68] sm:$0xff] %v572_v50   ;;  %v577_v53 = vpack.c.bf16 %v370_v51, %v369_v47 }
  0x35   : > { %v372_v54 = vadd.f32 %v688_v18, %v336_v0 }
  0x36   : > { %597 = vst [vmem:[%s708_s5 + $0x70] sm:$0xff] %v577_v53  }
  0x37   : > { %v582_v55 = vpack.c.bf16 %v372_v54, %v371_v52 }
  0x39   : > { %598 = vst [vmem:[%s708_s5 + $0x78] sm:$0xff] %v582_v55  }
  0x3a PF: > { %s14_s15 = sadd.s32 1, %s616_s15  }
  0x3b   : > { %p11_p4 = scmp.ge.s32.totalorder %s14_s15, 4  }
  0x3d   :  { %13 = sbr.rel (!%p11_p4) target bundleno = 1 (0x1), region = 66 }

// kernel: down_forward.4
= control target key start
LH: loop header
LB: loop body
LE: loop exit
PB: predicated region body
PF: predicated region fallthrough
CT: control target
= control target key end

     0   :  { %s1401_s12 = smov 0   ;;  %s1403_s13 = smov 0   ;;  %s1633_s0 = inlined_call_operand.vmem [shape: bf16[512,256], index: 0, kind: input, shape index: {}]   ;;  %s1634_s1 = inlined_call_operand.vmem [shape: bf16[256,128], index: 1, kind: input, shape index: {}]   ;;  %s1635_s2 = inlined_call_operand.vmem [shape: f32[512,128], index: 2, kind: output, shape index: {0}]   ;;  %s1636_s3 = inlined_call_operand.vmem [shape: f32[16,128], index: 3, kind: output, shape index: {1}]  }
   0x1   :  { %s1405_s14 = smov 0   ;;  %s1407_s15 = smov 0  }
   0x2   :  { %s1409_s16 = smov 0   ;;  %s1411_s17 = smov 0  }
   0x3   :  { %s1413_s18 = smov 0  }
   0x4 LB: > { %s23_s19 = sadd.s32 1, %s1370_s16  ;;  %s26_s20 = sadd.s32 1, %s1374_s17  ;;  %s1378_s18 = sphi %s1413_s18, %s14_s18   ;;  %s1374_s17 = sphi %s1411_s17, %s1642_s17   ;;  %s1370_s16 = sphi %s1409_s16, %s1641_s16   ;;  %s1366_s15 = sphi %s1407_s15, %s1640_s15   ;;  %s1362_s14 = sphi %s1405_s14, %s1639_s14   ;;  %s1358_s13 = sphi %s1403_s13, %s1638_s13   ;;  %s1354_s12 = sphi %s1401_s12, %s1637_s12  }
   0x5   : > { %p24_p0 = scmp.ge.s32.totalorder %s23_s19, 2  ;;  %p42_p1 = scmp.ne.s32.totalorder %s1358_s13, %s1354_s12 }
   0x6   : > { %p43_p2 = scmp.eq.s32.totalorder %s1378_s18, 0  ;;  %s35_s24 = sadd.s32 1, %s1358_s13 }
   0x7   : > { %s1644_s19 = smov (%p24_p0, %s23_s19), 0  ;;  %s1646_s20 = smov (!%p24_p0, %s26_s20), %s1374_s17 }
   0x8   : > { %p44_p3 = por %p43_p2, %p42_p1  ;;  %p28_p4 = scmp.ge.s32.totalorder %s1646_s20, 2 }
   0x9   : > { %s31_s21 = ssub.s32 %s1370_s16, %s1644_s19  ;;  %p1106_p6 = scmp.ge.s32.totalorder %s1378_s18, 4 }
   0xa   : > { %s1648_s20 = smov (%p28_p4, %s1646_s20), 0 }
   0xb   : > { %s30_s22 = ssub.s32 %s1374_s17, %s1648_s20  ;;  %146 = sbr.rel (%p1106_p6) target bundleno = 54 (0x36), region = 16 }
   0xc   : > { %s32_s23 = sor.u32 %s31_s21, %s30_s22 }
   0xd   : > { %p33_p5 = scmp.eq.s32.totalorder %s32_s23, 0 }
   0xf   : > { %s1452_s25 = scalar_select %p33_p5, %s1358_s13, %s35_s24  }
  0x10   : > { %149 = sbr.rel (!%p44_p3) target bundleno = 54 (0x36), region = 20  ;;  %s151_s26 = sand.u32 (%p44_p3), 1, %s1358_s13  }
  0x11   : > { %s1218_s27 = sshll.u32 (%p44_p3), %s1374_s17, 6  ;;  %s1107_s28 = sshll.u32 (%p44_p3), %s151_s26, 7 }
  0x12   : > { %s156_s29 = sadd.s32 (%p44_p3), %s1370_s16, %s1218_s27  ;;  %s1466_s7 = scalar_lea.vmem (%p44_p3), [#allocation3], %s1107_s28 }
  0x13   : > { %s1110_s30 = sshll.u32 (%p44_p3), %s156_s29, 2 }
  0x14   : > { %s1461_s6 = scalar_lea.vmem (%p44_p3), %s1633_s0, %s1110_s30 }
  0x15   : > { %v175_v0 = vld [vmem:[%s1461_s6] sm:$0xf]  ;;  %v177_v1 = vld [vmem:[%s1461_s6 + $0x8] sm:$0xf]  ;;  %v179_v2 = vld [vmem:[%s1461_s6 + $0x10] sm:$0xf] }
  0x16   : > { %176 = vst [vmem:[%s1466_s7] sm:$0xf] %v175_v0  ;;  %v181_v3 = vld [vmem:[%s1461_s6 + $0x18] sm:$0xf]  ;;  %v183_v4 = vld [vmem:[%s1461_s6 + $0x20] sm:$0xf] }
  0x17   : > { %178 = vst [vmem:[%s1466_s7 + $0x4] sm:$0xf] %v177_v1  ;;  %v185_v5 = vld [vmem:[%s1461_s6 + $0x28] sm:$0xf]  ;;  %v187_v6 = vld [vmem:[%s1461_s6 + $0x30] sm:$0xf] }
  0x18   : > { %180 = vst [vmem:[%s1466_s7 + $0x8] sm:$0xf] %v179_v2  ;;  %v189_v7 = vld [vmem:[%s1461_s6 + $0x38] sm:$0xf]  ;;  %v191_v8 = vld [vmem:[%s1461_s6 + $0x40] sm:$0xf] }
  0x19   : > { %182 = vst [vmem:[%s1466_s7 + $0xc] sm:$0xf] %v181_v3  ;;  %v193_v9 = vld [vmem:[%s1461_s6 + $0x48] sm:$0xf]  ;;  %v195_v10 = vld [vmem:[%s1461_s6 + $0x50] sm:$0xf] }
  0x1a   : > { %184 = vst [vmem:[%s1466_s7 + $0x10] sm:$0xf] %v183_v4  ;;  %v197_v11 = vld [vmem:[%s1461_s6 + $0x58] sm:$0xf]  ;;  %v199_v12 = vld [vmem:[%s1461_s6 + $0x60] sm:$0xf] }
  0x1b   : > { %186 = vst [vmem:[%s1466_s7 + $0x14] sm:$0xf] %v185_v5  ;;  %v201_v13 = vld [vmem:[%s1461_s6 + $0x68] sm:$0xf]  ;;  %v203_v14 = vld [vmem:[%s1461_s6 + $0x70] sm:$0xf] }
  0x1c   : > { %188 = vst [vmem:[%s1466_s7 + $0x18] sm:$0xf] %v187_v6  ;;  %v205_v15 = vld [vmem:[%s1461_s6 + $0x78] sm:$0xf]  ;;  %v207_v16 = vld [vmem:[%s1461_s6 + $0x80] sm:$0xf] }
  0x1d   : > { %190 = vst [vmem:[%s1466_s7 + $0x1c] sm:$0xf] %v189_v7  ;;  %v209_v17 = vld [vmem:[%s1461_s6 + $0x88] sm:$0xf]  ;;  %v211_v18 = vld [vmem:[%s1461_s6 + $0x90] sm:$0xf] }
  0x1e   : > { %192 = vst [vmem:[%s1466_s7 + $0x20] sm:$0xf] %v191_v8  ;;  %v213_v19 = vld [vmem:[%s1461_s6 + $0x98] sm:$0xf]  ;;  %v215_v20 = vld [vmem:[%s1461_s6 + $0xa0] sm:$0xf] }
  0x1f   : > { %194 = vst [vmem:[%s1466_s7 + $0x24] sm:$0xf] %v193_v9  ;;  %v217_v21 = vld [vmem:[%s1461_s6 + $0xa8] sm:$0xf]  ;;  %v219_v22 = vld [vmem:[%s1461_s6 + $0xb0] sm:$0xf] }
  0x20   : > { %196 = vst [vmem:[%s1466_s7 + $0x28] sm:$0xf] %v195_v10  ;;  %v221_v23 = vld [vmem:[%s1461_s6 + $0xb8] sm:$0xf]  ;;  %v223_v24 = vld [vmem:[%s1461_s6 + $0xc0] sm:$0xf] }
  0x21   : > { %198 = vst [vmem:[%s1466_s7 + $0x2c] sm:$0xf] %v197_v11  ;;  %v225_v25 = vld [vmem:[%s1461_s6 + $0xc8] sm:$0xf]  ;;  %v227_v26 = vld [vmem:[%s1461_s6 + $0xd0] sm:$0xf] }
  0x22   : > { %200 = vst [vmem:[%s1466_s7 + $0x30] sm:$0xf] %v199_v12  ;;  %v229_v27 = vld [vmem:[%s1461_s6 + $0xd8] sm:$0xf]  ;;  %v231_v28 = vld [vmem:[%s1461_s6 + $0xe0] sm:$0xf] }
  0x23   : > { %202 = vst [vmem:[%s1466_s7 + $0x34] sm:$0xf] %v201_v13  ;;  %v233_v29 = vld [vmem:[%s1461_s6 + $0xe8] sm:$0xf]  ;;  %v235_v30 = vld [vmem:[%s1461_s6 + $0xf0] sm:$0xf] }
  0x24   : > { %204 = vst [vmem:[%s1466_s7 + $0x38] sm:$0xf] %v203_v14  ;;  %v237_v31 = vld [vmem:[%s1461_s6 + $0xf8] sm:$0xf] }
  0x25   : > { %206 = vst [vmem:[%s1466_s7 + $0x3c] sm:$0xf] %v205_v15 }
  0x26   : > { %208 = vst [vmem:[%s1466_s7 + $0x40] sm:$0xf] %v207_v16 }
  0x27   : > { %210 = vst [vmem:[%s1466_s7 + $0x44] sm:$0xf] %v209_v17 }
  0x28   : > { %212 = vst [vmem:[%s1466_s7 + $0x48] sm:$0xf] %v211_v18 }
  0x29   : > { %214 = vst [vmem:[%s1466_s7 + $0x4c] sm:$0xf] %v213_v19 }
  0x2a   : > { %216 = vst [vmem:[%s1466_s7 + $0x50] sm:$0xf] %v215_v20 }
  0x2b   : > { %218 = vst [vmem:[%s1466_s7 + $0x54] sm:$0xf] %v217_v21 }
  0x2c   : > { %220 = vst [vmem:[%s1466_s7 + $0x58] sm:$0xf] %v219_v22 }
  0x2d   : > { %222 = vst [vmem:[%s1466_s7 + $0x5c] sm:$0xf] %v221_v23 }
  0x2e   : > { %224 = vst [vmem:[%s1466_s7 + $0x60] sm:$0xf] %v223_v24 }
  0x2f   : > { %226 = vst [vmem:[%s1466_s7 + $0x64] sm:$0xf] %v225_v25 }
  0x30   : > { %228 = vst [vmem:[%s1466_s7 + $0x68] sm:$0xf] %v227_v26 }
  0x31   : > { %230 = vst [vmem:[%s1466_s7 + $0x6c] sm:$0xf] %v229_v27 }
  0x32   : > { %232 = vst [vmem:[%s1466_s7 + $0x70] sm:$0xf] %v231_v28 }
  0x33   : > { %234 = vst [vmem:[%s1466_s7 + $0x74] sm:$0xf] %v233_v29 }
  0x34   : > { %236 = vst [vmem:[%s1466_s7 + $0x78] sm:$0xf] %v235_v30 }
  0x35   : > { %238 = vst [vmem:[%s1466_s7 + $0x7c] sm:$0xf] %v237_v31 }
  0x36 PF: > { %p1111_p7 = scmp.ge.s32.totalorder %s1378_s18, 1  ;;  %p334_p8 = scmp.lt.s32.totalorder %s1378_s18, 5 }
  0x38   : > { %p335_p9 = pnand %p1111_p7, %p334_p8 }
  0x39   : > { %s341_s8 = sand.u32 (!%p335_p9), 1, %s1354_s12   ;;  %s1113_s9 = sshll.u32 (!%p335_p9), %s1362_s14, 4 }
  0x3a   : > { %338 = sbr.rel (%p335_p9) target bundleno = 410 (0x19a), region = 65  ;;  %s1112_s10 = sshll.u32 (!%p335_p9), %s341_s8, 7 }
  0x3b   : > { %p375_p10 = scmp.lt.s32.totalorder (!%p335_p9), %s1113_s9, 31  ;;  %s1115_s11 = sshll.u32 (!%p335_p9), %s1366_s15, 5 }
  0x3c   : > { %p381_p11 = scmp.lt.s32.totalorder (!%p335_p9), %s1115_s11, 63  ;;  %p386_p12 = scmp.lt.s32.totalorder (!%p335_p9), %s1366_s15, 1 }
  0x3d   : > { %s1551_s6 = scalar_lea.vmem (!%p335_p9), [#allocation3], %s1112_s10  ;;  %p1118_p13 = scmp.ne.s32.totalorder (!%p335_p9), %s1362_s14, 0 }
  0x3f   : > { %s1650_s9 = smov (!%p375_p10, %s1113_s9), 31  ;;  %s1652_s11 = smov (!%p381_p11, %s1115_s11), 63 }
  0x40   : > { %s1114_s21 = sshll.u32 %s1650_s9, 2  ;;  %s1654_s15 = smov (!%p386_p12, %s1366_s15), 1 }
  0x41   : > { %s1538_s24 = scalar_lea.vmem %s1634_s1, %s1114_s21  ;;  %s1116_s26 = sshll.u32 %s1652_s11, 3 }
  0x42   : > { %s1544_s12 = scalar_lea.vmem %s1635_s2, %s1116_s26  ;;  %s1117_s29 = sshll.u32 %s1654_s15, 3 }
  0x43   : > { %s1549_s5 = scalar_lea.vmem %s1636_s3, %s1117_s29  ;;  %393 = sbr.rel (%p1118_p13) target bundleno = 105 (0x69), region = 73 }
  0x48   : > { %v1380_v32 = vmov 0.0  }
  0x49   : > { %394 = vst [vmem:[#allocation2 + $0xb0] sm:$0xff] %v1380_v32 }
  0x4a   : > { %395 = vst [vmem:[#allocation2] sm:$0xff] %v1380_v32 }
  0x4b   : > { %396 = vst [vmem:[#allocation2 + $0xd8] sm:$0xff] %v1380_v32 }
  0x4c   : > { %397 = vst [vmem:[#allocation2 + $0x18] sm:$0xff] %v1380_v32 }
  0x4d   : > { %398 = vst [vmem:[#allocation2 + $0x50] sm:$0xff] %v1380_v32 }
  0x4e   : > { %399 = vst [vmem:[#allocation2 + $0x68] sm:$0xff] %v1380_v32 }
  0x4f   : > { %400 = vst [vmem:[#allocation2 + $0x30] sm:$0xff] %v1380_v32 }
  0x50   : > { %401 = vst [vmem:[#allocation2 + $0x48] sm:$0xff] %v1380_v32 }
  0x51   : > { %402 = vst [vmem:[#allocation2 + $0x80] sm:$0xff] %v1380_v32 }
  0x52   : > { %403 = vst [vmem:[#allocation2 + $0x88] sm:$0xff] %v1380_v32 }
  0x53   : > { %404 = vst [vmem:[#allocation2 + $0xe8] sm:$0xff] %v1380_v32 }
  0x54   : > { %405 = vst [vmem:[#allocation2 + $0xb8] sm:$0xff] %v1380_v32 }
  0x55   : > { %406 = vst [vmem:[#allocation2 + $0x60] sm:$0xff] %v1380_v32 }
  0x56   : > { %407 = vst [vmem:[#allocation2 + $0xf0] sm:$0xff] %v1380_v32 }
  0x57   : > { %408 = vst [vmem:[#allocation2 + $0x8] sm:$0xff] %v1380_v32 }
  0x58   : > { %409 = vst [vmem:[#allocation2 + $0x78] sm:$0xff] %v1380_v32 }
  0x59   : > { %410 = vst [vmem:[#allocation2 + $0x38] sm:$0xff] %v1380_v32 }
  0x5a   : > { %411 = vst [vmem:[#allocation2 + $0x58] sm:$0xff] %v1380_v32 }
  0x5b   : > { %412 = vst [vmem:[#allocation2 + $0x40] sm:$0xff] %v1380_v32 }
  0x5c   : > { %413 = vst [vmem:[#allocation2 + $0xc8] sm:$0xff] %v1380_v32 }
  0x5d   : > { %414 = vst [vmem:[#allocation2 + $0xe0] sm:$0xff] %v1380_v32 }
  0x5e   : > { %415 = vst [vmem:[#allocation2 + $0x90] sm:$0xff] %v1380_v32 }
  0x5f   : > { %416 = vst [vmem:[#allocation2 + $0x70] sm:$0xff] %v1380_v32 }
  0x60   : > { %417 = vst [vmem:[#allocation2 + $0xc0] sm:$0xff] %v1380_v32 }
  0x61   : > { %418 = vst [vmem:[#allocation2 + $0xa8] sm:$0xff] %v1380_v32 }
  0x62   : > { %419 = vst [vmem:[#allocation2 + $0xd0] sm:$0xff] %v1380_v32 }
  0x63   : > { %420 = vst [vmem:[#allocation2 + $0x10] sm:$0xff] %v1380_v32 }
  0x64   : > { %421 = vst [vmem:[#allocation2 + $0x28] sm:$0xff] %v1380_v32 }
  0x65   : > { %422 = vst [vmem:[#allocation2 + $0xa0] sm:$0xff] %v1380_v32 }
  0x66   : > { %423 = vst [vmem:[#allocation2 + $0xf8] sm:$0xff] %v1380_v32 }
  0x67   : > { %424 = vst [vmem:[#allocation2 + $0x20] sm:$0xff] %v1380_v32 }
  0x68   : > { %425 = vst [vmem:[#allocation2 + $0x98] sm:$0xff] %v1380_v32 }
  0x69 PF: > { %v1242_v33 = vld [vmem:[%s1538_s24 + $0x38] sm:$0xff]  ;;  %v1241_v34 = vld [vmem:[%s1538_s24 + $0x30] sm:$0xff]  ;;  %v1240_v35 = vld [vmem:[%s1538_s24 + $0x28] sm:$0xff]  ;;  %p1215_p0 = scmp.ne.s32.totalorder %s1362_s14, 1 }
  0x6a   : > { %650 = vmatpush.bf16.msra.mxu0 %v1242_v33  ;;  %1243 = vmatpush.bf16.msra.mxu1 %v1242_v33  ;;  %v1239_v36 = vld [vmem:[%s1538_s24 + $0x20] sm:$0xff]  ;;  %v1238_v37 = vld [vmem:[%s1538_s24 + $0x18] sm:$0xff]  ;;  %v1237_v38 = vld [vmem:[%s1538_s24 + $0x10] sm:$0xff] }
  0x6b   : > { %1244 = vmatpush.bf16.msra.mxu2 %v1242_v33  ;;  %1245 = vmatpush.bf16.msra.mxu3 %v1242_v33  ;;  %v1236_v39 = vld [vmem:[%s1538_s24 + $0x8] sm:$0xff]  ;;  %v1235_v40 = vld [vmem:[%s1538_s24] sm:$0xff]  ;;  %v1221_v49 = vld [vmem:[%s1551_s6 + $0x10] sm:$0xff] }
  0x6c   : > { %v1219_v41 = vld [vmem:[%s1551_s6] sm:$0xff]  ;;  %v1220_v45 = vld [vmem:[%s1551_s6 + $0x8] sm:$0xff]  ;;  %v1225_v50 = vld [vmem:[%s1551_s6 + $0x30] sm:$0xff] }
  0x6d   : > { %v1223_v42 = vld [vmem:[%s1551_s6 + $0x20] sm:$0xff]  ;;  %v1224_v46 = vld [vmem:[%s1551_s6 + $0x28] sm:$0xff]  ;;  %v1229_v51 = vld [vmem:[%s1551_s6 + $0x50] sm:$0xff] }
  0x6e   : > { %651 = vmatpush.bf16.msra.mxu0 %v1241_v34  ;;  %1246 = vmatpush.bf16.msra.mxu1 %v1241_v34  ;;  %v1227_v43 = vld [vmem:[%s1551_s6 + $0x40] sm:$0xff]  ;;  %v1228_v47 = vld [vmem:[%s1551_s6 + $0x48] sm:$0xff]  ;;  %v1233_v52 = vld [vmem:[%s1551_s6 + $0x70] sm:$0xff] }
  0x6f   : > { %1247 = vmatpush.bf16.msra.mxu2 %v1241_v34  ;;  %1248 = vmatpush.bf16.msra.mxu3 %v1241_v34  ;;  %v1231_v44 = vld [vmem:[%s1551_s6 + $0x60] sm:$0xff]  ;;  %v1232_v48 = vld [vmem:[%s1551_s6 + $0x68] sm:$0xff]  ;;  %v1222_v53 = vld [vmem:[%s1551_s6 + $0x18] sm:$0xff] }
  0x70   : > { %v1226_v54 = vld [vmem:[%s1551_s6 + $0x38] sm:$0xff]  ;;  %v426_v57 = vld [vmem:[#allocation2 + $0xb0] sm:$0xff]  ;;  %v434_v58 = vld [vmem:[#allocation2 + $0x80] sm:$0xff] }
  0x71   : > { %v1230_v55 = vld [vmem:[%s1551_s6 + $0x58] sm:$0xff]  ;;  %v450_v0 = vld [vmem:[#allocation2 + $0xa8] sm:$0xff]  ;;  %v427_v1 = vld [vmem:[#allocation2] sm:$0xff] }
  0x72   : > { %652 = vmatpush.bf16.msra.mxu0 %v1240_v35  ;;  %1249 = vmatpush.bf16.msra.mxu1 %v1240_v35  ;;  %v1234_v56 = vld [vmem:[%s1551_s6 + $0x78] sm:$0xff]  ;;  %v435_v2 = vld [vmem:[#allocation2 + $0x88] sm:$0xff]  ;;  %v451_v12 = vld [vmem:[#allocation2 + $0xd0] sm:$0xff] }
  0x73   : > { %1250 = vmatpush.bf16.msra.mxu2 %v1240_v35  ;;  %1251 = vmatpush.bf16.msra.mxu3 %v1240_v35  ;;  %v442_v63 = vld [vmem:[#allocation2 + $0x38] sm:$0xff]  ;;  %v436_v14 = vld [vmem:[#allocation2 + $0xe8] sm:$0xff]  ;;  %v444_v23 = vld [vmem:[#allocation2 + $0x40] sm:$0xff] }
  0x74   : > { %v443_v11 = vld [vmem:[#allocation2 + $0x58] sm:$0xff]  ;;  %v452_v24 = vld [vmem:[#allocation2 + $0x10] sm:$0xff]  ;;  %v445_v35 = vld [vmem:[#allocation2 + $0xc8] sm:$0xff] }
  0x75   : > { %v428_v13 = vld [vmem:[#allocation2 + $0xd8] sm:$0xff] }
  0x76   : > { %653 = vmatpush.bf16.msra.mxu0 %v1239_v36  ;;  %1252 = vmatpush.bf16.msra.mxu1 %v1239_v36  ;;  %v429_v25 = vld [vmem:[#allocation2 + $0x18] sm:$0xff] }
  0x77   : > { %1253 = vmatpush.bf16.msra.mxu2 %v1239_v36  ;;  %1254 = vmatpush.bf16.msra.mxu3 %v1239_v36  ;;  %v437_v26 = vld [vmem:[#allocation2 + $0xb8] sm:$0xff]  ;;  %v453_v36 = vld [vmem:[#allocation2 + $0x28] sm:$0xff] }
  0x7a   : > { %654 = vmatpush.bf16.msra.mxu0 %v1238_v37  ;;  %1255 = vmatpush.bf16.msra.mxu1 %v1238_v37 }
  0x7b   : > { %1256 = vmatpush.bf16.msra.mxu2 %v1238_v37  ;;  %1257 = vmatpush.bf16.msra.mxu3 %v1238_v37  ;;  %v430_v37 = vld [vmem:[#allocation2 + $0x50] sm:$0xff] }
  0x7e   : > { %655 = vmatpush.bf16.msra.mxu0 %v1237_v38  ;;  %1258 = vmatpush.bf16.msra.mxu1 %v1237_v38 }
  0x7f   : > { %1259 = vmatpush.bf16.msra.mxu2 %v1237_v38  ;;  %1260 = vmatpush.bf16.msra.mxu3 %v1237_v38  ;;  %v438_v38 = vld [vmem:[#allocation2 + $0x60] sm:$0xff] }
  0x82   : > { %656 = vmatpush.bf16.msra.mxu0 %v1236_v39  ;;  %1261 = vmatpush.bf16.msra.mxu1 %v1236_v39 }
  0x83   : > { %1262 = vmatpush.bf16.msra.mxu2 %v1236_v39  ;;  %1263 = vmatpush.bf16.msra.mxu3 %v1236_v39 }
  0x86   : > { %657 = vmatpush.bf16.msra.mxu0 %v1235_v40  ;;  %1264 = vmatpush.bf16.msra.mxu1 %v1235_v40 }
  0x87   : > { %1265 = vmatpush.bf16.msra.mxu2 %v1235_v40  ;;  %1266 = vmatpush.bf16.msra.mxu3 %v1235_v40 }
  0x89   : > { %658 = vmatmul.bf16.vlgmr.msra.gmra.mxu0 %v1219_v41  ;;  %678 = vmatmul.bf16.vlgmr.msra.gmra.mxu1 %v1223_v42 }
  0x8a   : > { %698 = vmatmul.bf16.vlgmr.msra.gmra.mxu2 %v1227_v43  ;;  %718 = vmatmul.bf16.vlgmr.msra.gmra.mxu3 %v1231_v44 }
  0x99   : > { %663 = vmatmul.bf16.gmra.mxu0 %v1220_v45  ;;  %683 = vmatmul.bf16.gmra.mxu1 %v1224_v46 }
  0x9a   : > { %703 = vmatmul.bf16.gmra.mxu2 %v1228_v47  ;;  %723 = vmatmul.bf16.gmra.mxu3 %v1232_v48  ;;  %v446_v47 = vld [vmem:[#allocation2 + $0xe0] sm:$0xff] }
  0x9b   : > { %v454_v48 = vld [vmem:[#allocation2 + $0xa0] sm:$0xff] }
  0xa9   : > { %668 = vmatmul.bf16.gmra.mxu0 %v1221_v49  ;;  %688 = vmatmul.bf16.gmra.mxu1 %v1225_v50  ;;  %v431_v49 = vld [vmem:[#allocation2 + $0x68] sm:$0xff]  ;;  %v439_v50 = vld [vmem:[#allocation2 + $0xf0] sm:$0xff] }
  0xaa   : > { %708 = vmatmul.bf16.gmra.mxu2 %v1229_v51  ;;  %728 = vmatmul.bf16.gmra.mxu3 %v1233_v52 }
  0xb9   : > { %673 = vmatmul.bf16.gmra.mxu0 %v1222_v53  ;;  %693 = vmatmul.bf16.gmra.mxu1 %v1226_v54 }
  0xba   : > { %713 = vmatmul.bf16.gmra.mxu2 %v1230_v55  ;;  %733 = vmatmul.bf16.gmra.mxu3 %v1234_v56 }
 0x106   : > { %v659_v59 = vpop.f32.mrf.mxu0  ;;  %v679_v60 = vpop.f32.mrf.mxu1 }
 0x107   : > { %v739_v61 = vadd.f32 %v659_v59, %v426_v57  ;;  %v747_v62 = vadd.f32 %v679_v60, %v434_v58  ;;  %v447_v59 = vld [vmem:[#allocation2 + $0x90] sm:$0xff]  ;;  %v455_v60 = vld [vmem:[#allocation2 + $0xf8] sm:$0xff] }
 0x109   : > { %771 = vst [vmem:[#allocation2 + $0xb0] sm:$0xff] %v739_v61  ;;  %v432_v61 = vld [vmem:[#allocation2 + $0x30] sm:$0xff] }
 0x10a   : > { %779 = vst [vmem:[#allocation2 + $0x80] sm:$0xff] %v747_v62  ;;  %v440_v62 = vld [vmem:[#allocation2 + $0x8] sm:$0xff] }
 0x10d   : > { %v699_v3 = vpop.f32.mrf.mxu2  ;;  %v719_v4 = vpop.f32.mrf.mxu3 }
 0x10e   : > { %v755_v5 = vadd.f32 %v699_v3, %v442_v63  ;;  %v763_v6 = vadd.f32 %v719_v4, %v450_v0  ;;  %v661_v7 = vpop.f32.mrf.mxu0  ;;  %v681_v8 = vpop.f32.mrf.mxu1 }
 0x10f   : > { %v740_v9 = vadd.f32 %v661_v7, %v427_v1  ;;  %v748_v10 = vadd.f32 %v681_v8, %v435_v2  ;;  %v448_v7 = vld [vmem:[#allocation2 + $0x70] sm:$0xff]  ;;  %v456_v8 = vld [vmem:[#allocation2 + $0x20] sm:$0xff] }
 0x110   : > { %787 = vst [vmem:[#allocation2 + $0x38] sm:$0xff] %v755_v5 }
 0x111   : > { %795 = vst [vmem:[#allocation2 + $0xa8] sm:$0xff] %v763_v6 }
 0x112   : > { %772 = vst [vmem:[#allocation2] sm:$0xff] %v740_v9  ;;  %v433_v9 = vld [vmem:[#allocation2 + $0x48] sm:$0xff] }
 0x113   : > { %780 = vst [vmem:[#allocation2 + $0x88] sm:$0xff] %v748_v10  ;;  %v441_v10 = vld [vmem:[#allocation2 + $0x78] sm:$0xff] }
 0x115   : > { %v701_v15 = vpop.f32.mrf.mxu2  ;;  %v721_v16 = vpop.f32.mrf.mxu3 }
 0x116   : > { %v756_v17 = vadd.f32 %v701_v15, %v443_v11  ;;  %v764_v18 = vadd.f32 %v721_v16, %v451_v12  ;;  %v664_v19 = vpop.f32.mrf.mxu0  ;;  %v684_v20 = vpop.f32.mrf.mxu1 }
 0x117   : > { %v741_v21 = vadd.f32 %v664_v19, %v428_v13  ;;  %v749_v22 = vadd.f32 %v684_v20, %v436_v14  ;;  %v449_v19 = vld [vmem:[#allocation2 + $0xc0] sm:$0xff]  ;;  %v457_v20 = vld [vmem:[#allocation2 + $0x98] sm:$0xff] }
 0x118   : > { %788 = vst [vmem:[#allocation2 + $0x58] sm:$0xff] %v756_v17 }
 0x119   : > { %796 = vst [vmem:[#allocation2 + $0xd0] sm:$0xff] %v764_v18 }
 0x11a   : > { %773 = vst [vmem:[#allocation2 + $0xd8] sm:$0xff] %v741_v21 }
 0x11b   : > { %781 = vst [vmem:[#allocation2 + $0xe8] sm:$0xff] %v749_v22 }
 0x11d   : > { %v704_v27 = vpop.f32.mrf.mxu2  ;;  %v724_v28 = vpop.f32.mrf.mxu3 }
 0x11e   : > { %v757_v29 = vadd.f32 %v704_v27, %v444_v23  ;;  %v765_v30 = vadd.f32 %v724_v28, %v452_v24  ;;  %v666_v31 = vpop.f32.mrf.mxu0  ;;  %v686_v32 = vpop.f32.mrf.mxu1 }
 0x11f   : > { %v742_v33 = vadd.f32 %v666_v31, %v429_v25  ;;  %v750_v34 = vadd.f32 %v686_v32, %v437_v26 }
 0x120   : > { %789 = vst [vmem:[#allocation2 + $0x40] sm:$0xff] %v757_v29 }
 0x121   : > { %797 = vst [vmem:[#allocation2 + $0x10] sm:$0xff] %v765_v30 }
 0x122   : > { %774 = vst [vmem:[#allocation2 + $0x18] sm:$0xff] %v742_v33 }
 0x123   : > { %782 = vst [vmem:[#allocation2 + $0xb8] sm:$0xff] %v750_v34 }
 0x125   : > { %v706_v39 = vpop.f32.mrf.mxu2  ;;  %v726_v40 = vpop.f32.mrf.mxu3 }
 0x126   : > { %v758_v41 = vadd.f32 %v706_v39, %v445_v35  ;;  %v766_v42 = vadd.f32 %v726_v40, %v453_v36  ;;  %v669_v43 = vpop.f32.mrf.mxu0  ;;  %v689_v44 = vpop.f32.mrf.mxu1 }
 0x127   : > { %v743_v45 = vadd.f32 %v669_v43, %v430_v37  ;;  %v751_v46 = vadd.f32 %v689_v44, %v438_v38 }
 0x128   : > { %790 = vst [vmem:[#allocation2 + $0xc8] sm:$0xff] %v758_v41 }
 0x129   : > { %798 = vst [vmem:[#allocation2 + $0x28] sm:$0xff] %v766_v42 }
 0x12a   : > { %775 = vst [vmem:[#allocation2 + $0x50] sm:$0xff] %v743_v45 }
 0x12b   : > { %783 = vst [vmem:[#allocation2 + $0x60] sm:$0xff] %v751_v46 }
 0x12d   : > { %v709_v51 = vpop.f32.mrf.mxu2  ;;  %v729_v52 = vpop.f32.mrf.mxu3 }
 0x12e   : > { %v759_v53 = vadd.f32 %v709_v51, %v446_v47  ;;  %v767_v54 = vadd.f32 %v729_v52, %v454_v48  ;;  %v671_v55 = vpop.f32.mrf.mxu0  ;;  %v691_v56 = vpop.f32.mrf.mxu1 }
 0x12f   : > { %v744_v57 = vadd.f32 %v671_v55, %v431_v49  ;;  %v752_v58 = vadd.f32 %v691_v56, %v439_v50 }
 0x130   : > { %791 = vst [vmem:[#allocation2 + $0xe0] sm:$0xff] %v759_v53 }
 0x131   : > { %799 = vst [vmem:[#allocation2 + $0xa0] sm:$0xff] %v767_v54 }
 0x132   : > { %776 = vst [vmem:[#allocation2 + $0x68] sm:$0xff] %v744_v57 }
 0x133   : > { %784 = vst [vmem:[#allocation2 + $0xf0] sm:$0xff] %v752_v58 }
 0x135   : > { %v711_v63 = vpop.f32.mrf.mxu2  ;;  %v731_v0 = vpop.f32.mrf.mxu3 }
 0x136   : > { %v760_v1 = vadd.f32 %v711_v63, %v447_v59  ;;  %v768_v2 = vadd.f32 %v731_v0, %v455_v60  ;;  %v674_v3 = vpop.f32.mrf.mxu0  ;;  %v694_v4 = vpop.f32.mrf.mxu1 }
 0x137   : > { %v745_v5 = vadd.f32 %v674_v3, %v432_v61  ;;  %v753_v6 = vadd.f32 %v694_v4, %v440_v62 }
 0x138   : > { %792 = vst [vmem:[#allocation2 + $0x90] sm:$0xff] %v760_v1 }
 0x139   : > { %800 = vst [vmem:[#allocation2 + $0xf8] sm:$0xff] %v768_v2 }
 0x13a   : > { %777 = vst [vmem:[#allocation2 + $0x30] sm:$0xff] %v745_v5 }
 0x13b   : > { %785 = vst [vmem:[#allocation2 + $0x8] sm:$0xff] %v753_v6 }
 0x13d   : > { %v714_v11 = vpop.f32.mrf.mxu2  ;;  %v734_v12 = vpop.f32.mrf.mxu3 }
 0x13e   : > { %v761_v13 = vadd.f32 %v714_v11, %v448_v7  ;;  %v769_v14 = vadd.f32 %v734_v12, %v456_v8  ;;  %v676_v15 = vpop.f32.mrf.mxu0  ;;  %v696_v16 = vpop.f32.mrf.mxu1 }
 0x13f   : > { %v746_v17 = vadd.f32 %v676_v15, %v433_v9  ;;  %v754_v18 = vadd.f32 %v696_v16, %v441_v10 }
 0x140   : > { %793 = vst [vmem:[#allocation2 + $0x70] sm:$0xff] %v761_v13 }
 0x141   : > { %801 = vst [vmem:[#allocation2 + $0x20] sm:$0xff] %v769_v14 }
 0x142   : > { %778 = vst [vmem:[#allocation2 + $0x48] sm:$0xff] %v746_v17 }
 0x143   : > { %786 = vst [vmem:[#allocation2 + $0x78] sm:$0xff] %v754_v18 }
 0x145   : > { %v716_v21 = vpop.f32.mrf.mxu2  ;;  %v736_v22 = vpop.f32.mrf.mxu3  ;;  %806 = sbr.rel (%p1215_p0) target bundleno = 410 (0x19a), region = 77 }
 0x146   : > { %v762_v23 = vadd.f32 %v716_v21, %v449_v19  ;;  %v770_v24 = vadd.f32 %v736_v22, %v457_v20 }
 0x148   : > { %794 = vst [vmem:[#allocation2 + $0xc0] sm:$0xff] %v762_v23 }
 0x149   : > { %802 = vst [vmem:[#allocation2 + $0x98] sm:$0xff] %v770_v24 }
 0x14a   : > { %v807_v25 = vld [vmem:[#allocation2 + $0xb0] sm:$0xff]  ;;  %v808_v26 = vld [vmem:[#allocation2] sm:$0xff]  ;;  %v809_v27 = vld [vmem:[#allocation2 + $0xd8] sm:$0xff] }
 0x14b   : > { %839 = vst [vmem:[%s1544_s12] sm:$0xff] %v807_v25  ;;  %v908_v28 = vmul.f32 %v807_v25, %v807_v25  ;;  %v871_v29 = vadd.f32 %v808_v26, %v807_v25  ;;  %v909_v30 = vmul.f32 %v808_v26, %v808_v26  ;;  %v910_v31 = vmul.f32 %v809_v27, %v809_v27  ;;  %v810_v32 = vld [vmem:[#allocation2 + $0x18] sm:$0xff]  ;;  %v811_v33 = vld [vmem:[#allocation2 + $0x50] sm:$0xff]  ;;  %v812_v37 = vld [vmem:[#allocation2 + $0x68] sm:$0xff] }
 0x14c   : > { %840 = vst [vmem:[%s1544_s12 + $0x8] sm:$0xff] %v808_v26  ;;  %v911_v36 = vmul.f32 %v810_v32, %v810_v32  ;;  %v912_v40 = vmul.f32 %v811_v33, %v811_v33  ;;  %v813_v41 = vld [vmem:[#allocation2 + $0x30] sm:$0xff]  ;;  %v913_v44 = vmul.f32 %v812_v37, %v812_v37  ;;  %v814_v45 = vld [vmem:[#allocation2 + $0x48] sm:$0xff]  ;;  %v815_v46 = vld [vmem:[#allocation2 + $0x80] sm:$0xff] }
 0x14d   : > { %v940_v34 = vadd.f32 %v909_v30, %v908_v28  ;;  %841 = vst [vmem:[%s1544_s12 + $0x10] sm:$0xff] %v809_v27  ;;  %v872_v35 = vadd.f32 %v871_v29, %v809_v27  ;;  %v914_v49 = vmul.f32 %v813_v41, %v813_v41  ;;  %v816_v50 = vld [vmem:[#allocation2 + $0x88] sm:$0xff]  ;;  %v915_v54 = vmul.f32 %v814_v45, %v814_v45  ;;  %v818_v55 = vld [vmem:[#allocation2 + $0xb8] sm:$0xff]  ;;  %v819_v56 = vld [vmem:[#allocation2 + $0x60] sm:$0xff] }
 0x14e   : > { %842 = vst [vmem:[%s1544_s12 + $0x18] sm:$0xff] %v810_v32  ;;  %v817_v51 = vld [vmem:[#allocation2 + $0xe8] sm:$0xff]  ;;  %v916_v59 = vmul.f32 %v815_v46, %v815_v46  ;;  %v820_v60 = vld [vmem:[#allocation2 + $0xf0] sm:$0xff]  ;;  %v917_v0 = vmul.f32 %v816_v50, %v816_v50  ;;  %v822_v1 = vld [vmem:[#allocation2 + $0x78] sm:$0xff]  ;;  %v919_v10 = vmul.f32 %v818_v55, %v818_v55  ;;  %v920_v15 = vmul.f32 %v819_v56, %v819_v56 }
 0x14f   : > { %v941_v38 = vadd.f32 %v940_v34, %v910_v31  ;;  %v873_v39 = vadd.f32 %v872_v35, %v810_v32  ;;  %843 = vst [vmem:[%s1544_s12 + $0x20] sm:$0xff] %v811_v33  ;;  %v821_v61 = vld [vmem:[#allocation2 + $0x8] sm:$0xff]  ;;  %v823_v2 = vld [vmem:[#allocation2 + $0x38] sm:$0xff]  ;;  %v918_v5 = vmul.f32 %v817_v51, %v817_v51  ;;  %v825_v7 = vld [vmem:[#allocation2 + $0x40] sm:$0xff]  ;;  %v921_v20 = vmul.f32 %v820_v60, %v820_v60 }
 0x150   : > { %844 = vst [vmem:[%s1544_s12 + $0x28] sm:$0xff] %v812_v37  ;;  %v824_v6 = vld [vmem:[#allocation2 + $0x58] sm:$0xff]  ;;  %v826_v11 = vld [vmem:[#allocation2 + $0xc8] sm:$0xff]  ;;  %v827_v12 = vld [vmem:[#allocation2 + $0xe0] sm:$0xff]  ;;  %v922_v25 = vmul.f32 %v821_v61, %v821_v61  ;;  %v923_v30 = vmul.f32 %v822_v1, %v822_v1  ;;  %v924_v35 = vmul.f32 %v823_v2, %v823_v2 }
 0x151   : > { %v942_v42 = vadd.f32 %v941_v38, %v911_v36  ;;  %v874_v43 = vadd.f32 %v873_v39, %v811_v33  ;;  %845 = vst [vmem:[%s1544_s12 + $0x30] sm:$0xff] %v813_v41  ;;  %v828_v16 = vld [vmem:[#allocation2 + $0x90] sm:$0xff]  ;;  %v830_v21 = vld [vmem:[#allocation2 + $0xc0] sm:$0xff]  ;;  %v831_v22 = vld [vmem:[#allocation2 + $0xa8] sm:$0xff] }
 0x152   : > { %846 = vst [vmem:[%s1544_s12 + $0x38] sm:$0xff] %v814_v45  ;;  %v829_v17 = vld [vmem:[#allocation2 + $0x70] sm:$0xff]  ;;  %v834_v31 = vld [vmem:[#allocation2 + $0x28] sm:$0xff]  ;;  %v835_v32 = vld [vmem:[#allocation2 + $0xa0] sm:$0xff] }
 0x153   : > { %v943_v47 = vadd.f32 %v942_v42, %v912_v40  ;;  %v875_v48 = vadd.f32 %v874_v43, %v812_v37  ;;  %847 = vst [vmem:[%s1544_s12 + $0x40] sm:$0xff] %v815_v46  ;;  %v832_v26 = vld [vmem:[#allocation2 + $0xd0] sm:$0xff]  ;;  %v836_v36 = vld [vmem:[#allocation2 + $0xf8] sm:$0xff]  ;;  %v837_v37 = vld [vmem:[#allocation2 + $0x20] sm:$0xff]  ;;  %v925_v40 = vmul.f32 %v824_v6, %v824_v6 }
 0x154   : > { %848 = vst [vmem:[%s1544_s12 + $0x48] sm:$0xff] %v816_v50  ;;  %v833_v27 = vld [vmem:[#allocation2 + $0x10] sm:$0xff] }
 0x155   : > { %v944_v52 = vadd.f32 %v943_v47, %v913_v44  ;;  %v876_v53 = vadd.f32 %v875_v48, %v813_v41  ;;  %849 = vst [vmem:[%s1544_s12 + $0x50] sm:$0xff] %v817_v51  ;;  %v838_v41 = vld [vmem:[#allocation2 + $0x98] sm:$0xff]  ;;  %v926_v44 = vmul.f32 %v825_v7, %v825_v7  ;;  %v927_v47 = vmul.f32 %v826_v11, %v826_v11 }
 0x156   : > { %850 = vst [vmem:[%s1544_s12 + $0x58] sm:$0xff] %v818_v55 }
 0x157   : > { %v945_v57 = vadd.f32 %v944_v52, %v914_v49  ;;  %v877_v58 = vadd.f32 %v876_v53, %v814_v45  ;;  %851 = vst [vmem:[%s1544_s12 + $0x60] sm:$0xff] %v819_v56  ;;  %v929_v53 = vmul.f32 %v828_v16, %v828_v16 }
 0x158   : > { %852 = vst [vmem:[%s1544_s12 + $0x68] sm:$0xff] %v820_v60 }
 0x159   : > { %v946_v62 = vadd.f32 %v945_v57, %v915_v54  ;;  %v878_v63 = vadd.f32 %v877_v58, %v815_v46  ;;  %853 = vst [vmem:[%s1544_s12 + $0x70] sm:$0xff] %v821_v61 }
 0x15a   : > { %854 = vst [vmem:[%s1544_s12 + $0x78] sm:$0xff] %v822_v1 }
 0x15b   : > { %v947_v3 = vadd.f32 %v946_v62, %v916_v59  ;;  %v879_v4 = vadd.f32 %v878_v63, %v816_v50  ;;  %855 = vst [vmem:[%s1544_s12 + $0x80] sm:$0xff] %v823_v2  ;;  %v928_v50 = vmul.f32 %v827_v12, %v827_v12  ;;  %v931_v59 = vmul.f32 %v830_v21, %v830_v21 }
 0x15c   : > { %856 = vst [vmem:[%s1544_s12 + $0x88] sm:$0xff] %v824_v6  ;;  %v932_v62 = vmul.f32 %v831_v22, %v831_v22 }
 0x15d   : > { %v948_v8 = vadd.f32 %v947_v3, %v917_v0  ;;  %v880_v9 = vadd.f32 %v879_v4, %v817_v51  ;;  %857 = vst [vmem:[%s1544_s12 + $0x90] sm:$0xff] %v825_v7  ;;  %v934_v4 = vmul.f32 %v833_v27, %v833_v27 }
 0x15e   : > { %858 = vst [vmem:[%s1544_s12 + $0x98] sm:$0xff] %v826_v11 }
 0x15f   : > { %v949_v13 = vadd.f32 %v948_v8, %v918_v5  ;;  %v881_v14 = vadd.f32 %v880_v9, %v818_v55  ;;  %859 = vst [vmem:[%s1544_s12 + $0xa0] sm:$0xff] %v827_v12 }
 0x160   : > { %860 = vst [vmem:[%s1544_s12 + $0xa8] sm:$0xff] %v828_v16 }
 0x161   : > { %v950_v18 = vadd.f32 %v949_v13, %v919_v10  ;;  %v882_v19 = vadd.f32 %v881_v14, %v819_v56  ;;  %861 = vst [vmem:[%s1544_s12 + $0xb0] sm:$0xff] %v829_v17  ;;  %v930_v56 = vmul.f32 %v829_v17, %v829_v17  ;;  %v936_v10 = vmul.f32 %v835_v32, %v835_v32 }
 0x162   : > { %862 = vst [vmem:[%s1544_s12 + $0xb8] sm:$0xff] %v830_v21  ;;  %v937_v13 = vmul.f32 %v836_v36, %v836_v36 }
 0x163   : > { %v951_v23 = vadd.f32 %v950_v18, %v920_v15  ;;  %v883_v24 = vadd.f32 %v882_v19, %v820_v60  ;;  %863 = vst [vmem:[%s1544_s12 + $0xc0] sm:$0xff] %v831_v22  ;;  %v939_v19 = vmul.f32 %v838_v41, %v838_v41 }
 0x164   : > { %864 = vst [vmem:[%s1544_s12 + $0xc8] sm:$0xff] %v832_v26 }
 0x165   : > { %v952_v28 = vadd.f32 %v951_v23, %v921_v20  ;;  %v884_v29 = vadd.f32 %v883_v24, %v821_v61  ;;  %865 = vst [vmem:[%s1544_s12 + $0xd0] sm:$0xff] %v833_v27 }
 0x166   : > { %866 = vst [vmem:[%s1544_s12 + $0xd8] sm:$0xff] %v834_v31 }
 0x167   : > { %v953_v33 = vadd.f32 %v952_v28, %v922_v25  ;;  %v885_v34 = vadd.f32 %v884_v29, %v822_v1  ;;  %867 = vst [vmem:[%s1544_s12 + $0xe0] sm:$0xff] %v835_v32  ;;  %v933_v1 = vmul.f32 %v832_v26, %v832_v26 }
 0x168   : > { %868 = vst [vmem:[%s1544_s12 + $0xe8] sm:$0xff] %v836_v36 }
 0x169   : > { %v954_v38 = vadd.f32 %v953_v33, %v923_v30  ;;  %v886_v39 = vadd.f32 %v885_v34, %v823_v2  ;;  %869 = vst [vmem:[%s1544_s12 + $0xf0] sm:$0xff] %v837_v37 }
 0x16a   : > { %870 = vst [vmem:[%s1544_s12 + $0xf8] sm:$0xff] %v838_v41 }
 0x16b   : > { %v955_v42 = vadd.f32 %v954_v38, %v924_v35  ;;  %v887_v43 = vadd.f32 %v886_v39, %v824_v6 }
 0x16d   : > { %v956_v45 = vadd.f32 %v955_v42, %v925_v40  ;;  %v888_v46 = vadd.f32 %v887_v43, %v825_v7  ;;  %v935_v7 = vmul.f32 %v834_v31, %v834_v31 }
 0x16f   : > { %v957_v48 = vadd.f32 %v956_v45, %v926_v44  ;;  %v889_v49 = vadd.f32 %v888_v46, %v826_v11 }
 0x171   : > { %v958_v51 = vadd.f32 %v957_v48, %v927_v47  ;;  %v890_v52 = vadd.f32 %v889_v49, %v827_v12 }
 0x173   : > { %v959_v54 = vadd.f32 %v958_v51, %v928_v50  ;;  %v891_v55 = vadd.f32 %v890_v52, %v828_v16  ;;  %v938_v16 = vmul.f32 %v837_v37, %v837_v37 }
 0x175   : > { %v960_v57 = vadd.f32 %v959_v54, %v929_v53  ;;  %v892_v58 = vadd.f32 %v891_v55, %v829_v17 }
 0x177   : > { %v961_v60 = vadd.f32 %v960_v57, %v930_v56  ;;  %v893_v61 = vadd.f32 %v892_v58, %v830_v21 }
 0x179   : > { %v962_v63 = vadd.f32 %v961_v60, %v931_v59  ;;  %v894_v0 = vadd.f32 %v893_v61, %v831_v22 }
 0x17b   : > { %v963_v2 = vadd.f32 %v962_v63, %v932_v62  ;;  %v895_v3 = vadd.f32 %v894_v0, %v832_v26  ;;  %v977_v26 = vlaneseq }
 0x17d   : > { %v964_v5 = vadd.f32 %v963_v2, %v933_v1  ;;  %v896_v6 = vadd.f32 %v895_v3, %v833_v27 }
 0x17f   : > { %v965_v8 = vadd.f32 %v964_v5, %v934_v4  ;;  %v897_v9 = vadd.f32 %v896_v6, %v834_v31  ;;  %v978_v31 = vshrl.u32 %v977_v26, 7 }
 0x181   : > { %v966_v11 = vadd.f32 %v965_v8, %v935_v7  ;;  %v898_v12 = vadd.f32 %v897_v9, %v835_v32  ;;  %vm980_vm0 = vcmp.eq.s32.totalorder %v978_v31, 1  ;;  %vm979_vm1 = vcmp.eq.s32.totalorder %v978_v31, 0 }
 0x183   : > { %v967_v14 = vadd.f32 %v966_v11, %v936_v10  ;;  %v899_v15 = vadd.f32 %v898_v12, %v836_v36 }
 0x185   : > { %v968_v17 = vadd.f32 %v967_v14, %v937_v13  ;;  %v900_v18 = vadd.f32 %v899_v15, %v837_v37 }
 0x187   : > { %v969_v20 = vadd.f32 %v968_v17, %v938_v16  ;;  %v901_v21 = vadd.f32 %v900_v18, %v838_v41 }
 0x189   : > { %v902_v22 = vrot.slane %v901_v21, 4  ;;  %v970_v23 = vadd.f32 %v969_v20, %v939_v19 }
 0x18b   : > { %v903_v24 = vadd.f32 %v902_v22, %v901_v21  ;;  %v971_v25 = vrot.slane %v970_v23, 4 }
 0x18d   : > { %v904_v27 = vrot.slane %v903_v24, 2  ;;  %v972_v28 = vadd.f32 %v971_v25, %v970_v23 }
 0x18f   : > { %v905_v29 = vadd.f32 %v904_v27, %v903_v24  ;;  %v973_v30 = vrot.slane %v972_v28, 2 }
 0x191   : > { %v906_v32 = vrot.slane %v905_v29, 1  ;;  %v974_v33 = vadd.f32 %v973_v30, %v972_v28 }
 0x193   : > { %v975_v34 = vrot.slane %v974_v33, 1  ;;  %v907_v35 = vadd.f32 %v906_v32, %v905_v29 }
 0x195   : > { %v976_v36 = vadd.f32 %v975_v34, %v974_v33 }
 0x197   : > { %v981_v37 = vsel %vm980_vm0, %v976_v36, 0.0 }
 0x198   : > { %v982_v38 = vsel %vm979_vm1, %v907_v35, %v981_v37 }
 0x199   : > { %983 = vst [vmem:[%s1549_s5] sm:$0xff] %v982_v38 }
 0x19a PF: > { %s14_s18 = sadd.s32 1, %s1378_s18   ;;  %s1637_s12 = smov %s1358_s13 }
 0x19b   : > { %p11_p1 = scmp.ge.s32.totalorder %s14_s18, 6   ;;  %s1638_s13 = smov %s1452_s25 }
 0x19c   : > { %s1639_s14 = smov %s1370_s16  ;;  %s1640_s15 = smov %s1374_s17 }
 0x19d   : > { %s1641_s16 = smov %s1644_s19  ;;  %s1642_s17 = smov %s1648_s20 }
 0x19e   :  { %13 = sbr.rel (!%p11_p1) target bundleno = 4 (0x4), region = 127 }

// kernel: down_forward.6
= control target key start
LH: loop header
LB: loop body
LE: loop exit
PB: predicated region body
PF: predicated region fallthrough
CT: control target
= control target key end

     0   :  { %s1401_s12 = smov 0   ;;  %s1403_s13 = smov 0   ;;  %s1633_s0 = inlined_call_operand.vmem [shape: bf16[512,384], index: 0, kind: input, shape index: {}]   ;;  %s1634_s1 = inlined_call_operand.vmem [shape: bf16[384,128], index: 1, kind: input, shape index: {}]   ;;  %s1635_s2 = inlined_call_operand.vmem [shape: f32[512,128], index: 2, kind: output, shape index: {0}]   ;;  %s1636_s3 = inlined_call_operand.vmem [shape: f32[16,128], index: 3, kind: output, shape index: {1}]  }
   0x1   :  { %s1405_s14 = smov 0   ;;  %s1407_s15 = smov 0  }
   0x2   :  { %s1409_s16 = smov 0   ;;  %s1411_s17 = smov 0  }
   0x3   :  { %s1413_s18 = smov 0  }
   0x4 LB: > { %s23_s19 = sadd.s32 1, %s1370_s16  ;;  %s26_s20 = sadd.s32 1, %s1374_s17  ;;  %s1378_s18 = sphi %s1413_s18, %s14_s18   ;;  %s1374_s17 = sphi %s1411_s17, %s1642_s17   ;;  %s1370_s16 = sphi %s1409_s16, %s1641_s16   ;;  %s1366_s15 = sphi %s1407_s15, %s1640_s15   ;;  %s1362_s14 = sphi %s1405_s14, %s1639_s14   ;;  %s1358_s13 = sphi %s1403_s13, %s1638_s13   ;;  %s1354_s12 = sphi %s1401_s12, %s1637_s12  }
   0x5   : > { %p24_p0 = scmp.ge.s32.totalorder %s23_s19, 3  ;;  %p42_p1 = scmp.ne.s32.totalorder %s1358_s13, %s1354_s12 }
   0x6   : > { %p43_p2 = scmp.eq.s32.totalorder %s1378_s18, 0  ;;  %s35_s24 = sadd.s32 1, %s1358_s13 }
   0x7   : > { %s1644_s19 = smov (%p24_p0, %s23_s19), 0  ;;  %s1646_s20 = smov (!%p24_p0, %s26_s20), %s1374_s17 }
   0x8   : > { %p44_p3 = por %p43_p2, %p42_p1  ;;  %p28_p4 = scmp.ge.s32.totalorder %s1646_s20, 2 }
   0x9   : > { %s31_s21 = ssub.s32 %s1370_s16, %s1644_s19  ;;  %p1106_p6 = scmp.ge.s32.totalorder %s1378_s18, 6 }
   0xa   : > { %s1648_s20 = smov (%p28_p4, %s1646_s20), 0 }
   0xb   : > { %s30_s22 = ssub.s32 %s1374_s17, %s1648_s20  ;;  %146 = sbr.rel (%p1106_p6) target bundleno = 55 (0x37), region = 16 }
   0xc   : > { %s32_s23 = sor.u32 %s31_s21, %s30_s22 }
   0xd   : > { %p33_p5 = scmp.eq.s32.totalorder %s32_s23, 0 }
   0xf   : > { %s1452_s25 = scalar_select %p33_p5, %s1358_s13, %s35_s24  }
  0x10   : > { %149 = sbr.rel (!%p44_p3) target bundleno = 55 (0x37), region = 20  ;;  %s151_s26 = sand.u32 (%p44_p3), 1, %s1358_s13  }
  0x11   : > { %s1266_s27 = smul.u32 (%p44_p3), 96, %s1374_s17  ;;  %s1107_s28 = sshll.u32 (%p44_p3), %s151_s26, 7 }
  0x12   : > { %s1466_s7 = scalar_lea.vmem (%p44_p3), [#allocation3], %s1107_s28 }
  0x13   : > { %s156_s29 = sadd.s32 (%p44_p3), %s1370_s16, %s1266_s27 }
  0x14   : > { %s1110_s30 = sshll.u32 (%p44_p3), %s156_s29, 2 }
  0x15   : > { %s1461_s6 = scalar_lea.vmem %s1633_s0, %s1110_s30 }
  0x16   : > { %v175_v0 = vld [vmem:[%s1461_s6] sm:$0xf]  ;;  %v177_v1 = vld [vmem:[%s1461_s6 + $0xc] sm:$0xf]  ;;  %v179_v2 = vld [vmem:[%s1461_s6 + $0x18] sm:$0xf] }
  0x17   : > { %176 = vst [vmem:[%s1466_s7] sm:$0xf] %v175_v0  ;;  %v181_v3 = vld [vmem:[%s1461_s6 + $0x24] sm:$0xf]  ;;  %v183_v4 = vld [vmem:[%s1461_s6 + $0x30] sm:$0xf] }
  0x18   : > { %178 = vst [vmem:[%s1466_s7 + $0x4] sm:$0xf] %v177_v1  ;;  %v185_v5 = vld [vmem:[%s1461_s6 + $0x3c] sm:$0xf]  ;;  %v187_v6 = vld [vmem:[%s1461_s6 + $0x48] sm:$0xf] }
  0x19   : > { %180 = vst [vmem:[%s1466_s7 + $0x8] sm:$0xf] %v179_v2  ;;  %v189_v7 = vld [vmem:[%s1461_s6 + $0x54] sm:$0xf]  ;;  %v191_v8 = vld [vmem:[%s1461_s6 + $0x60] sm:$0xf] }
  0x1a   : > { %182 = vst [vmem:[%s1466_s7 + $0xc] sm:$0xf] %v181_v3  ;;  %v193_v9 = vld [vmem:[%s1461_s6 + $0x6c] sm:$0xf]  ;;  %v195_v10 = vld [vmem:[%s1461_s6 + $0x78] sm:$0xf] }
  0x1b   : > { %184 = vst [vmem:[%s1466_s7 + $0x10] sm:$0xf] %v183_v4  ;;  %v197_v11 = vld [vmem:[%s1461_s6 + $0x84] sm:$0xf]  ;;  %v199_v12 = vld [vmem:[%s1461_s6 + $0x90] sm:$0xf] }
  0x1c   : > { %186 = vst [vmem:[%s1466_s7 + $0x14] sm:$0xf] %v185_v5  ;;  %v201_v13 = vld [vmem:[%s1461_s6 + $0x9c] sm:$0xf]  ;;  %v203_v14 = vld [vmem:[%s1461_s6 + $0xa8] sm:$0xf] }
  0x1d   : > { %188 = vst [vmem:[%s1466_s7 + $0x18] sm:$0xf] %v187_v6  ;;  %v205_v15 = vld [vmem:[%s1461_s6 + $0xb4] sm:$0xf]  ;;  %v207_v16 = vld [vmem:[%s1461_s6 + $0xc0] sm:$0xf] }
  0x1e   : > { %190 = vst [vmem:[%s1466_s7 + $0x1c] sm:$0xf] %v189_v7  ;;  %v209_v17 = vld [vmem:[%s1461_s6 + $0xcc] sm:$0xf]  ;;  %v211_v18 = vld [vmem:[%s1461_s6 + $0xd8] sm:$0xf] }
  0x1f   : > { %192 = vst [vmem:[%s1466_s7 + $0x20] sm:$0xf] %v191_v8  ;;  %v213_v19 = vld [vmem:[%s1461_s6 + $0xe4] sm:$0xf]  ;;  %v215_v20 = vld [vmem:[%s1461_s6 + $0xf0] sm:$0xf] }
  0x20   : > { %194 = vst [vmem:[%s1466_s7 + $0x24] sm:$0xf] %v193_v9  ;;  %v217_v21 = vld [vmem:[%s1461_s6 + $0xfc] sm:$0xf]  ;;  %v219_v22 = vld [vmem:[%s1461_s6 + $0x108] sm:$0xf] }
  0x21   : > { %196 = vst [vmem:[%s1466_s7 + $0x28] sm:$0xf] %v195_v10  ;;  %v221_v23 = vld [vmem:[%s1461_s6 + $0x114] sm:$0xf]  ;;  %v223_v24 = vld [vmem:[%s1461_s6 + $0x120] sm:$0xf] }
  0x22   : > { %198 = vst [vmem:[%s1466_s7 + $0x2c] sm:$0xf] %v197_v11  ;;  %v225_v25 = vld [vmem:[%s1461_s6 + $0x12c] sm:$0xf]  ;;  %v227_v26 = vld [vmem:[%s1461_s6 + $0x138] sm:$0xf] }
  0x23   : > { %200 = vst [vmem:[%s1466_s7 + $0x30] sm:$0xf] %v199_v12  ;;  %v229_v27 = vld [vmem:[%s1461_s6 + $0x144] sm:$0xf]  ;;  %v231_v28 = vld [vmem:[%s1461_s6 + $0x150] sm:$0xf] }
  0x24   : > { %202 = vst [vmem:[%s1466_s7 + $0x34] sm:$0xf] %v201_v13  ;;  %v233_v29 = vld [vmem:[%s1461_s6 + $0x15c] sm:$0xf]  ;;  %v235_v30 = vld [vmem:[%s1461_s6 + $0x168] sm:$0xf] }
  0x25   : > { %204 = vst [vmem:[%s1466_s7 + $0x38] sm:$0xf] %v203_v14  ;;  %v237_v31 = vld [vmem:[%s1461_s6 + $0x174] sm:$0xf] }
  0x26   : > { %206 = vst [vmem:[%s1466_s7 + $0x3c] sm:$0xf] %v205_v15 }
  0x27   : > { %208 = vst [vmem:[%s1466_s7 + $0x40] sm:$0xf] %v207_v16 }
  0x28   : > { %210 = vst [vmem:[%s1466_s7 + $0x44] sm:$0xf] %v209_v17 }
  0x29   : > { %212 = vst [vmem:[%s1466_s7 + $0x48] sm:$0xf] %v211_v18 }
  0x2a   : > { %214 = vst [vmem:[%s1466_s7 + $0x4c] sm:$0xf] %v213_v19 }
  0x2b   : > { %216 = vst [vmem:[%s1466_s7 + $0x50] sm:$0xf] %v215_v20 }
  0x2c   : > { %218 = vst [vmem:[%s1466_s7 + $0x54] sm:$0xf] %v217_v21 }
  0x2d   : > { %220 = vst [vmem:[%s1466_s7 + $0x58] sm:$0xf] %v219_v22 }
  0x2e   : > { %222 = vst [vmem:[%s1466_s7 + $0x5c] sm:$0xf] %v221_v23 }
  0x2f   : > { %224 = vst [vmem:[%s1466_s7 + $0x60] sm:$0xf] %v223_v24 }
  0x30   : > { %226 = vst [vmem:[%s1466_s7 + $0x64] sm:$0xf] %v225_v25 }
  0x31   : > { %228 = vst [vmem:[%s1466_s7 + $0x68] sm:$0xf] %v227_v26 }
  0x32   : > { %230 = vst [vmem:[%s1466_s7 + $0x6c] sm:$0xf] %v229_v27 }
  0x33   : > { %232 = vst [vmem:[%s1466_s7 + $0x70] sm:$0xf] %v231_v28 }
  0x34   : > { %234 = vst [vmem:[%s1466_s7 + $0x74] sm:$0xf] %v233_v29 }
  0x35   : > { %236 = vst [vmem:[%s1466_s7 + $0x78] sm:$0xf] %v235_v30 }
  0x36   : > { %238 = vst [vmem:[%s1466_s7 + $0x7c] sm:$0xf] %v237_v31 }
  0x37 PF: > { %p1111_p7 = scmp.ge.s32.totalorder %s1378_s18, 1  ;;  %p334_p8 = scmp.lt.s32.totalorder %s1378_s18, 7 }
  0x39   : > { %p335_p9 = pnand %p1111_p7, %p334_p8 }
  0x3a   : > { %s341_s8 = sand.u32 (!%p335_p9), 1, %s1354_s12   ;;  %s1113_s9 = sshll.u32 (!%p335_p9), %s1362_s14, 4 }
  0x3b   : > { %338 = sbr.rel (%p335_p9) target bundleno = 411 (0x19b), region = 65  ;;  %s1112_s10 = sshll.u32 (!%p335_p9), %s341_s8, 7 }
  0x3c   : > { %p375_p10 = scmp.lt.s32.totalorder (!%p335_p9), %s1113_s9, 47  ;;  %s1115_s11 = sshll.u32 (!%p335_p9), %s1366_s15, 5 }
  0x3d   : > { %p381_p11 = scmp.lt.s32.totalorder (!%p335_p9), %s1115_s11, 63  ;;  %p386_p12 = scmp.lt.s32.totalorder (!%p335_p9), %s1366_s15, 1 }
  0x3e   : > { %s1551_s6 = scalar_lea.vmem (!%p335_p9), [#allocation3], %s1112_s10  ;;  %p1118_p13 = scmp.ne.s32.totalorder (!%p335_p9), %s1362_s14, 0 }
  0x40   : > { %s1650_s9 = smov (!%p375_p10, %s1113_s9), 47  ;;  %s1652_s11 = smov (!%p381_p11, %s1115_s11), 63 }
  0x41   : > { %s1114_s21 = sshll.u32 %s1650_s9, 2  ;;  %s1654_s15 = smov (!%p386_p12, %s1366_s15), 1 }
  0x42   : > { %s1538_s24 = scalar_lea.vmem %s1634_s1, %s1114_s21  ;;  %s1116_s26 = sshll.u32 %s1652_s11, 3 }
  0x43   : > { %s1544_s12 = scalar_lea.vmem %s1635_s2, %s1116_s26  ;;  %s1117_s29 = sshll.u32 %s1654_s15, 3 }
  0x44   : > { %s1549_s5 = scalar_lea.vmem %s1636_s3, %s1117_s29  ;;  %393 = sbr.rel (%p1118_p13) target bundleno = 106 (0x6a), region = 73 }
  0x49   : > { %v1380_v32 = vmov 0.0  }
  0x4a   : > { %394 = vst [vmem:[#allocation2 + $0xb0] sm:$0xff] %v1380_v32 }
  0x4b   : > { %395 = vst [vmem:[#allocation2] sm:$0xff] %v1380_v32 }
  0x4c   : > { %396 = vst [vmem:[#allocation2 + $0xd8] sm:$0xff] %v1380_v32 }
  0x4d   : > { %397 = vst [vmem:[#allocation2 + $0x18] sm:$0xff] %v1380_v32 }
  0x4e   : > { %398 = vst [vmem:[#allocation2 + $0x50] sm:$0xff] %v1380_v32 }
  0x4f   : > { %399 = vst [vmem:[#allocation2 + $0x68] sm:$0xff] %v1380_v32 }
  0x50   : > { %400 = vst [vmem:[#allocation2 + $0x30] sm:$0xff] %v1380_v32 }
  0x51   : > { %401 = vst [vmem:[#allocation2 + $0x48] sm:$0xff] %v1380_v32 }
  0x52   : > { %402 = vst [vmem:[#allocation2 + $0x80] sm:$0xff] %v1380_v32 }
  0x53   : > { %403 = vst [vmem:[#allocation2 + $0x88] sm:$0xff] %v1380_v32 }
  0x54   : > { %404 = vst [vmem:[#allocation2 + $0xe8] sm:$0xff] %v1380_v32 }
  0x55   : > { %405 = vst [vmem:[#allocation2 + $0xb8] sm:$0xff] %v1380_v32 }
  0x56   : > { %406 = vst [vmem:[#allocation2 + $0x60] sm:$0xff] %v1380_v32 }
  0x57   : > { %407 = vst [vmem:[#allocation2 + $0xf0] sm:$0xff] %v1380_v32 }
  0x58   : > { %408 = vst [vmem:[#allocation2 + $0x8] sm:$0xff] %v1380_v32 }
  0x59   : > { %409 = vst [vmem:[#allocation2 + $0x78] sm:$0xff] %v1380_v32 }
  0x5a   : > { %410 = vst [vmem:[#allocation2 + $0x38] sm:$0xff] %v1380_v32 }
  0x5b   : > { %411 = vst [vmem:[#allocation2 + $0x58] sm:$0xff] %v1380_v32 }
  0x5c   : > { %412 = vst [vmem:[#allocation2 + $0x40] sm:$0xff] %v1380_v32 }
  0x5d   : > { %413 = vst [vmem:[#allocation2 + $0xc8] sm:$0xff] %v1380_v32 }
  0x5e   : > { %414 = vst [vmem:[#allocation2 + $0xe0] sm:$0xff] %v1380_v32 }
  0x5f   : > { %415 = vst [vmem:[#allocation2 + $0x90] sm:$0xff] %v1380_v32 }
  0x60   : > { %416 = vst [vmem:[#allocation2 + $0x70] sm:$0xff] %v1380_v32 }
  0x61   : > { %417 = vst [vmem:[#allocation2 + $0xc0] sm:$0xff] %v1380_v32 }
  0x62   : > { %418 = vst [vmem:[#allocation2 + $0xa8] sm:$0xff] %v1380_v32 }
  0x63   : > { %419 = vst [vmem:[#allocation2 + $0xd0] sm:$0xff] %v1380_v32 }
  0x64   : > { %420 = vst [vmem:[#allocation2 + $0x10] sm:$0xff] %v1380_v32 }
  0x65   : > { %421 = vst [vmem:[#allocation2 + $0x28] sm:$0xff] %v1380_v32 }
  0x66   : > { %422 = vst [vmem:[#allocation2 + $0xa0] sm:$0xff] %v1380_v32 }
  0x67   : > { %423 = vst [vmem:[#allocation2 + $0xf8] sm:$0xff] %v1380_v32 }
  0x68   : > { %424 = vst [vmem:[#allocation2 + $0x20] sm:$0xff] %v1380_v32 }
  0x69   : > { %425 = vst [vmem:[#allocation2 + $0x98] sm:$0xff] %v1380_v32 }
  0x6a PF: > { %v1241_v33 = vld [vmem:[%s1538_s24 + $0x38] sm:$0xff]  ;;  %v1240_v34 = vld [vmem:[%s1538_s24 + $0x30] sm:$0xff]  ;;  %v1239_v35 = vld [vmem:[%s1538_s24 + $0x28] sm:$0xff]  ;;  %p1215_p0 = scmp.ne.s32.totalorder %s1362_s14, 2 }
  0x6b   : > { %650 = vmatpush.bf16.msra.mxu0 %v1241_v33  ;;  %1242 = vmatpush.bf16.msra.mxu1 %v1241_v33  ;;  %v1238_v36 = vld [vmem:[%s1538_s24 + $0x20] sm:$0xff]  ;;  %v1237_v37 = vld [vmem:[%s1538_s24 + $0x18] sm:$0xff]  ;;  %v1236_v38 = vld [vmem:[%s1538_s24 + $0x10] sm:$0xff] }
  0x6c   : > { %1243 = vmatpush.bf16.msra.mxu2 %v1241_v33  ;;  %1244 = vmatpush.bf16.msra.mxu3 %v1241_v33  ;;  %v1235_v39 = vld [vmem:[%s1538_s24 + $0x8] sm:$0xff]  ;;  %v1234_v40 = vld [vmem:[%s1538_s24] sm:$0xff]  ;;  %v1220_v49 = vld [vmem:[%s1551_s6 + $0x10] sm:$0xff] }
  0x6d   : > { %v1218_v41 = vld [vmem:[%s1551_s6] sm:$0xff]  ;;  %v1219_v45 = vld [vmem:[%s1551_s6 + $0x8] sm:$0xff]  ;;  %v1224_v50 = vld [vmem:[%s1551_s6 + $0x30] sm:$0xff] }
  0x6e   : > { %v1222_v42 = vld [vmem:[%s1551_s6 + $0x20] sm:$0xff]  ;;  %v1223_v46 = vld [vmem:[%s1551_s6 + $0x28] sm:$0xff]  ;;  %v1228_v51 = vld [vmem:[%s1551_s6 + $0x50] sm:$0xff] }
  0x6f   : > { %651 = vmatpush.bf16.msra.mxu0 %v1240_v34  ;;  %1245 = vmatpush.bf16.msra.mxu1 %v1240_v34  ;;  %v1226_v43 = vld [vmem:[%s1551_s6 + $0x40] sm:$0xff]  ;;  %v1227_v47 = vld [vmem:[%s1551_s6 + $0x48] sm:$0xff]  ;;  %v1232_v52 = vld [vmem:[%s1551_s6 + $0x70] sm:$0xff] }
  0x70   : > { %1246 = vmatpush.bf16.msra.mxu2 %v1240_v34  ;;  %1247 = vmatpush.bf16.msra.mxu3 %v1240_v34  ;;  %v1230_v44 = vld [vmem:[%s1551_s6 + $0x60] sm:$0xff]  ;;  %v1231_v48 = vld [vmem:[%s1551_s6 + $0x68] sm:$0xff]  ;;  %v1221_v53 = vld [vmem:[%s1551_s6 + $0x18] sm:$0xff] }
  0x71   : > { %v1225_v54 = vld [vmem:[%s1551_s6 + $0x38] sm:$0xff]  ;;  %v426_v57 = vld [vmem:[#allocation2 + $0xb0] sm:$0xff]  ;;  %v434_v58 = vld [vmem:[#allocation2 + $0x80] sm:$0xff] }
  0x72   : > { %v1229_v55 = vld [vmem:[%s1551_s6 + $0x58] sm:$0xff]  ;;  %v450_v0 = vld [vmem:[#allocation2 + $0xa8] sm:$0xff]  ;;  %v427_v1 = vld [vmem:[#allocation2] sm:$0xff] }
  0x73   : > { %652 = vmatpush.bf16.msra.mxu0 %v1239_v35  ;;  %1248 = vmatpush.bf16.msra.mxu1 %v1239_v35  ;;  %v1233_v56 = vld [vmem:[%s1551_s6 + $0x78] sm:$0xff]  ;;  %v435_v2 = vld [vmem:[#allocation2 + $0x88] sm:$0xff]  ;;  %v451_v12 = vld [vmem:[#allocation2 + $0xd0] sm:$0xff] }
  0x74   : > { %1249 = vmatpush.bf16.msra.mxu2 %v1239_v35  ;;  %1250 = vmatpush.bf16.msra.mxu3 %v1239_v35  ;;  %v442_v63 = vld [vmem:[#allocation2 + $0x38] sm:$0xff]  ;;  %v436_v14 = vld [vmem:[#allocation2 + $0xe8] sm:$0xff]  ;;  %v444_v23 = vld [vmem:[#allocation2 + $0x40] sm:$0xff] }
  0x75   : > { %v443_v11 = vld [vmem:[#allocation2 + $0x58] sm:$0xff]  ;;  %v452_v24 = vld [vmem:[#allocation2 + $0x10] sm:$0xff]  ;;  %v445_v35 = vld [vmem:[#allocation2 + $0xc8] sm:$0xff] }
  0x76   : > { %v428_v13 = vld [vmem:[#allocation2 + $0xd8] sm:$0xff] }
  0x77   : > { %653 = vmatpush.bf16.msra.mxu0 %v1238_v36  ;;  %1251 = vmatpush.bf16.msra.mxu1 %v1238_v36  ;;  %v429_v25 = vld [vmem:[#allocation2 + $0x18] sm:$0xff] }
  0x78   : > { %1252 = vmatpush.bf16.msra.mxu2 %v1238_v36  ;;  %1253 = vmatpush.bf16.msra.mxu3 %v1238_v36  ;;  %v437_v26 = vld [vmem:[#allocation2 + $0xb8] sm:$0xff]  ;;  %v453_v36 = vld [vmem:[#allocation2 + $0x28] sm:$0xff] }
  0x7b   : > { %654 = vmatpush.bf16.msra.mxu0 %v1237_v37  ;;  %1254 = vmatpush.bf16.msra.mxu1 %v1237_v37 }
  0x7c   : > { %1255 = vmatpush.bf16.msra.mxu2 %v1237_v37  ;;  %1256 = vmatpush.bf16.msra.mxu3 %v1237_v37  ;;  %v430_v37 = vld [vmem:[#allocation2 + $0x50] sm:$0xff] }
  0x7f   : > { %655 = vmatpush.bf16.msra.mxu0 %v1236_v38  ;;  %1257 = vmatpush.bf16.msra.mxu1 %v1236_v38 }
  0x80   : > { %1258 = vmatpush.bf16.msra.mxu2 %v1236_v38  ;;  %1259 = vmatpush.bf16.msra.mxu3 %v1236_v38  ;;  %v438_v38 = vld [vmem:[#allocation2 + $0x60] sm:$0xff] }
  0x83   : > { %656 = vmatpush.bf16.msra.mxu0 %v1235_v39  ;;  %1260 = vmatpush.bf16.msra.mxu1 %v1235_v39 }
  0x84   : > { %1261 = vmatpush.bf16.msra.mxu2 %v1235_v39  ;;  %1262 = vmatpush.bf16.msra.mxu3 %v1235_v39 }
  0x87   : > { %657 = vmatpush.bf16.msra.mxu0 %v1234_v40  ;;  %1263 = vmatpush.bf16.msra.mxu1 %v1234_v40 }
  0x88   : > { %1264 = vmatpush.bf16.msra.mxu2 %v1234_v40  ;;  %1265 = vmatpush.bf16.msra.mxu3 %v1234_v40 }
  0x8a   : > { %658 = vmatmul.bf16.vlgmr.msra.gmra.mxu0 %v1218_v41  ;;  %678 = vmatmul.bf16.vlgmr.msra.gmra.mxu1 %v1222_v42 }
  0x8b   : > { %698 = vmatmul.bf16.vlgmr.msra.gmra.mxu2 %v1226_v43  ;;  %718 = vmatmul.bf16.vlgmr.msra.gmra.mxu3 %v1230_v44 }
  0x9a   : > { %663 = vmatmul.bf16.gmra.mxu0 %v1219_v45  ;;  %683 = vmatmul.bf16.gmra.mxu1 %v1223_v46 }
  0x9b   : > { %703 = vmatmul.bf16.gmra.mxu2 %v1227_v47  ;;  %723 = vmatmul.bf16.gmra.mxu3 %v1231_v48  ;;  %v446_v47 = vld [vmem:[#allocation2 + $0xe0] sm:$0xff] }
  0x9c   : > { %v454_v48 = vld [vmem:[#allocation2 + $0xa0] sm:$0xff] }
  0xaa   : > { %668 = vmatmul.bf16.gmra.mxu0 %v1220_v49  ;;  %688 = vmatmul.bf16.gmra.mxu1 %v1224_v50  ;;  %v431_v49 = vld [vmem:[#allocation2 + $0x68] sm:$0xff]  ;;  %v439_v50 = vld [vmem:[#allocation2 + $0xf0] sm:$0xff] }
  0xab   : > { %708 = vmatmul.bf16.gmra.mxu2 %v1228_v51  ;;  %728 = vmatmul.bf16.gmra.mxu3 %v1232_v52 }
  0xba   : > { %673 = vmatmul.bf16.gmra.mxu0 %v1221_v53  ;;  %693 = vmatmul.bf16.gmra.mxu1 %v1225_v54 }
  0xbb   : > { %713 = vmatmul.bf16.gmra.mxu2 %v1229_v55  ;;  %733 = vmatmul.bf16.gmra.mxu3 %v1233_v56 }
 0x107   : > { %v659_v59 = vpop.f32.mrf.mxu0  ;;  %v679_v60 = vpop.f32.mrf.mxu1 }
 0x108   : > { %v739_v61 = vadd.f32 %v659_v59, %v426_v57  ;;  %v747_v62 = vadd.f32 %v679_v60, %v434_v58  ;;  %v447_v59 = vld [vmem:[#allocation2 + $0x90] sm:$0xff]  ;;  %v455_v60 = vld [vmem:[#allocation2 + $0xf8] sm:$0xff] }
 0x10a   : > { %771 = vst [vmem:[#allocation2 + $0xb0] sm:$0xff] %v739_v61  ;;  %v432_v61 = vld [vmem:[#allocation2 + $0x30] sm:$0xff] }
 0x10b   : > { %779 = vst [vmem:[#allocation2 + $0x80] sm:$0xff] %v747_v62  ;;  %v440_v62 = vld [vmem:[#allocation2 + $0x8] sm:$0xff] }
 0x10e   : > { %v699_v3 = vpop.f32.mrf.mxu2  ;;  %v719_v4 = vpop.f32.mrf.mxu3 }
 0x10f   : > { %v755_v5 = vadd.f32 %v699_v3, %v442_v63  ;;  %v763_v6 = vadd.f32 %v719_v4, %v450_v0  ;;  %v661_v7 = vpop.f32.mrf.mxu0  ;;  %v681_v8 = vpop.f32.mrf.mxu1 }
 0x110   : > { %v740_v9 = vadd.f32 %v661_v7, %v427_v1  ;;  %v748_v10 = vadd.f32 %v681_v8, %v435_v2  ;;  %v448_v7 = vld [vmem:[#allocation2 + $0x70] sm:$0xff]  ;;  %v456_v8 = vld [vmem:[#allocation2 + $0x20] sm:$0xff] }
 0x111   : > { %787 = vst [vmem:[#allocation2 + $0x38] sm:$0xff] %v755_v5 }
 0x112   : > { %795 = vst [vmem:[#allocation2 + $0xa8] sm:$0xff] %v763_v6 }
 0x113   : > { %772 = vst [vmem:[#allocation2] sm:$0xff] %v740_v9  ;;  %v433_v9 = vld [vmem:[#allocation2 + $0x48] sm:$0xff] }
 0x114   : > { %780 = vst [vmem:[#allocation2 + $0x88] sm:$0xff] %v748_v10  ;;  %v441_v10 = vld [vmem:[#allocation2 + $0x78] sm:$0xff] }
 0x116   : > { %v701_v15 = vpop.f32.mrf.mxu2  ;;  %v721_v16 = vpop.f32.mrf.mxu3 }
 0x117   : > { %v756_v17 = vadd.f32 %v701_v15, %v443_v11  ;;  %v764_v18 = vadd.f32 %v721_v16, %v451_v12  ;;  %v664_v19 = vpop.f32.mrf.mxu0  ;;  %v684_v20 = vpop.f32.mrf.mxu1 }
 0x118   : > { %v741_v21 = vadd.f32 %v664_v19, %v428_v13  ;;  %v749_v22 = vadd.f32 %v684_v20, %v436_v14  ;;  %v449_v19 = vld [vmem:[#allocation2 + $0xc0] sm:$0xff]  ;;  %v457_v20 = vld [vmem:[#allocation2 + $0x98] sm:$0xff] }
 0x119   : > { %788 = vst [vmem:[#allocation2 + $0x58] sm:$0xff] %v756_v17 }
 0x11a   : > { %796 = vst [vmem:[#allocation2 + $0xd0] sm:$0xff] %v764_v18 }
 0x11b   : > { %773 = vst [vmem:[#allocation2 + $0xd8] sm:$0xff] %v741_v21 }
 0x11c   : > { %781 = vst [vmem:[#allocation2 + $0xe8] sm:$0xff] %v749_v22 }
 0x11e   : > { %v704_v27 = vpop.f32.mrf.mxu2  ;;  %v724_v28 = vpop.f32.mrf.mxu3 }
 0x11f   : > { %v757_v29 = vadd.f32 %v704_v27, %v444_v23  ;;  %v765_v30 = vadd.f32 %v724_v28, %v452_v24  ;;  %v666_v31 = vpop.f32.mrf.mxu0  ;;  %v686_v32 = vpop.f32.mrf.mxu1 }
 0x120   : > { %v742_v33 = vadd.f32 %v666_v31, %v429_v25  ;;  %v750_v34 = vadd.f32 %v686_v32, %v437_v26 }
 0x121   : > { %789 = vst [vmem:[#allocation2 + $0x40] sm:$0xff] %v757_v29 }
 0x122   : > { %797 = vst [vmem:[#allocation2 + $0x10] sm:$0xff] %v765_v30 }
 0x123   : > { %774 = vst [vmem:[#allocation2 + $0x18] sm:$0xff] %v742_v33 }
 0x124   : > { %782 = vst [vmem:[#allocation2 + $0xb8] sm:$0xff] %v750_v34 }
 0x126   : > { %v706_v39 = vpop.f32.mrf.mxu2  ;;  %v726_v40 = vpop.f32.mrf.mxu3 }
 0x127   : > { %v758_v41 = vadd.f32 %v706_v39, %v445_v35  ;;  %v766_v42 = vadd.f32 %v726_v40, %v453_v36  ;;  %v669_v43 = vpop.f32.mrf.mxu0  ;;  %v689_v44 = vpop.f32.mrf.mxu1 }
 0x128   : > { %v743_v45 = vadd.f32 %v669_v43, %v430_v37  ;;  %v751_v46 = vadd.f32 %v689_v44, %v438_v38 }
 0x129   : > { %790 = vst [vmem:[#allocation2 + $0xc8] sm:$0xff] %v758_v41 }
 0x12a   : > { %798 = vst [vmem:[#allocation2 + $0x28] sm:$0xff] %v766_v42 }
 0x12b   : > { %775 = vst [vmem:[#allocation2 + $0x50] sm:$0xff] %v743_v45 }
 0x12c   : > { %783 = vst [vmem:[#allocation2 + $0x60] sm:$0xff] %v751_v46 }
 0x12e   : > { %v709_v51 = vpop.f32.mrf.mxu2  ;;  %v729_v52 = vpop.f32.mrf.mxu3 }
 0x12f   : > { %v759_v53 = vadd.f32 %v709_v51, %v446_v47  ;;  %v767_v54 = vadd.f32 %v729_v52, %v454_v48  ;;  %v671_v55 = vpop.f32.mrf.mxu0  ;;  %v691_v56 = vpop.f32.mrf.mxu1 }
 0x130   : > { %v744_v57 = vadd.f32 %v671_v55, %v431_v49  ;;  %v752_v58 = vadd.f32 %v691_v56, %v439_v50 }
 0x131   : > { %791 = vst [vmem:[#allocation2 + $0xe0] sm:$0xff] %v759_v53 }
 0x132   : > { %799 = vst [vmem:[#allocation2 + $0xa0] sm:$0xff] %v767_v54 }
 0x133   : > { %776 = vst [vmem:[#allocation2 + $0x68] sm:$0xff] %v744_v57 }
 0x134   : > { %784 = vst [vmem:[#allocation2 + $0xf0] sm:$0xff] %v752_v58 }
 0x136   : > { %v711_v63 = vpop.f32.mrf.mxu2  ;;  %v731_v0 = vpop.f32.mrf.mxu3 }
 0x137   : > { %v760_v1 = vadd.f32 %v711_v63, %v447_v59  ;;  %v768_v2 = vadd.f32 %v731_v0, %v455_v60  ;;  %v674_v3 = vpop.f32.mrf.mxu0  ;;  %v694_v4 = vpop.f32.mrf.mxu1 }
 0x138   : > { %v745_v5 = vadd.f32 %v674_v3, %v432_v61  ;;  %v753_v6 = vadd.f32 %v694_v4, %v440_v62 }
 0x139   : > { %792 = vst [vmem:[#allocation2 + $0x90] sm:$0xff] %v760_v1 }
 0x13a   : > { %800 = vst [vmem:[#allocation2 + $0xf8] sm:$0xff] %v768_v2 }
 0x13b   : > { %777 = vst [vmem:[#allocation2 + $0x30] sm:$0xff] %v745_v5 }
 0x13c   : > { %785 = vst [vmem:[#allocation2 + $0x8] sm:$0xff] %v753_v6 }
 0x13e   : > { %v714_v11 = vpop.f32.mrf.mxu2  ;;  %v734_v12 = vpop.f32.mrf.mxu3 }
 0x13f   : > { %v761_v13 = vadd.f32 %v714_v11, %v448_v7  ;;  %v769_v14 = vadd.f32 %v734_v12, %v456_v8  ;;  %v676_v15 = vpop.f32.mrf.mxu0  ;;  %v696_v16 = vpop.f32.mrf.mxu1 }
 0x140   : > { %v746_v17 = vadd.f32 %v676_v15, %v433_v9  ;;  %v754_v18 = vadd.f32 %v696_v16, %v441_v10 }
 0x141   : > { %793 = vst [vmem:[#allocation2 + $0x70] sm:$0xff] %v761_v13 }
 0x142   : > { %801 = vst [vmem:[#allocation2 + $0x20] sm:$0xff] %v769_v14 }
 0x143   : > { %778 = vst [vmem:[#allocation2 + $0x48] sm:$0xff] %v746_v17 }
 0x144   : > { %786 = vst [vmem:[#allocation2 + $0x78] sm:$0xff] %v754_v18 }
 0x146   : > { %v716_v21 = vpop.f32.mrf.mxu2  ;;  %v736_v22 = vpop.f32.mrf.mxu3  ;;  %806 = sbr.rel (%p1215_p0) target bundleno = 411 (0x19b), region = 77 }
 0x147   : > { %v762_v23 = vadd.f32 %v716_v21, %v449_v19  ;;  %v770_v24 = vadd.f32 %v736_v22, %v457_v20 }
 0x149   : > { %794 = vst [vmem:[#allocation2 + $0xc0] sm:$0xff] %v762_v23 }
 0x14a   : > { %802 = vst [vmem:[#allocation2 + $0x98] sm:$0xff] %v770_v24 }
 0x14b   : > { %v807_v25 = vld [vmem:[#allocation2 + $0xb0] sm:$0xff]  ;;  %v808_v26 = vld [vmem:[#allocation2] sm:$0xff]  ;;  %v809_v27 = vld [vmem:[#allocation2 + $0xd8] sm:$0xff] }
 0x14c   : > { %839 = vst [vmem:[%s1544_s12] sm:$0xff] %v807_v25  ;;  %v908_v28 = vmul.f32 %v807_v25, %v807_v25  ;;  %v871_v29 = vadd.f32 %v808_v26, %v807_v25  ;;  %v909_v30 = vmul.f32 %v808_v26, %v808_v26  ;;  %v910_v31 = vmul.f32 %v809_v27, %v809_v27  ;;  %v810_v32 = vld [vmem:[#allocation2 + $0x18] sm:$0xff]  ;;  %v811_v33 = vld [vmem:[#allocation2 + $0x50] sm:$0xff]  ;;  %v812_v37 = vld [vmem:[#allocation2 + $0x68] sm:$0xff] }
 0x14d   : > { %840 = vst [vmem:[%s1544_s12 + $0x8] sm:$0xff] %v808_v26  ;;  %v911_v36 = vmul.f32 %v810_v32, %v810_v32  ;;  %v912_v40 = vmul.f32 %v811_v33, %v811_v33  ;;  %v813_v41 = vld [vmem:[#allocation2 + $0x30] sm:$0xff]  ;;  %v913_v44 = vmul.f32 %v812_v37, %v812_v37  ;;  %v814_v45 = vld [vmem:[#allocation2 + $0x48] sm:$0xff]  ;;  %v815_v46 = vld [vmem:[#allocation2 + $0x80] sm:$0xff] }
 0x14e   : > { %v940_v34 = vadd.f32 %v909_v30, %v908_v28  ;;  %841 = vst [vmem:[%s1544_s12 + $0x10] sm:$0xff] %v809_v27  ;;  %v872_v35 = vadd.f32 %v871_v29, %v809_v27  ;;  %v914_v49 = vmul.f32 %v813_v41, %v813_v41  ;;  %v816_v50 = vld [vmem:[#allocation2 + $0x88] sm:$0xff]  ;;  %v915_v54 = vmul.f32 %v814_v45, %v814_v45  ;;  %v818_v55 = vld [vmem:[#allocation2 + $0xb8] sm:$0xff]  ;;  %v819_v56 = vld [vmem:[#allocation2 + $0x60] sm:$0xff] }
 0x14f   : > { %842 = vst [vmem:[%s1544_s12 + $0x18] sm:$0xff] %v810_v32  ;;  %v817_v51 = vld [vmem:[#allocation2 + $0xe8] sm:$0xff]  ;;  %v916_v59 = vmul.f32 %v815_v46, %v815_v46  ;;  %v820_v60 = vld [vmem:[#allocation2 + $0xf0] sm:$0xff]  ;;  %v917_v0 = vmul.f32 %v816_v50, %v816_v50  ;;  %v822_v1 = vld [vmem:[#allocation2 + $0x78] sm:$0xff]  ;;  %v919_v10 = vmul.f32 %v818_v55, %v818_v55  ;;  %v920_v15 = vmul.f32 %v819_v56, %v819_v56 }
 0x150   : > { %v941_v38 = vadd.f32 %v940_v34, %v910_v31  ;;  %v873_v39 = vadd.f32 %v872_v35, %v810_v32  ;;  %843 = vst [vmem:[%s1544_s12 + $0x20] sm:$0xff] %v811_v33  ;;  %v821_v61 = vld [vmem:[#allocation2 + $0x8] sm:$0xff]  ;;  %v823_v2 = vld [vmem:[#allocation2 + $0x38] sm:$0xff]  ;;  %v918_v5 = vmul.f32 %v817_v51, %v817_v51  ;;  %v825_v7 = vld [vmem:[#allocation2 + $0x40] sm:$0xff]  ;;  %v921_v20 = vmul.f32 %v820_v60, %v820_v60 }
 0x151   : > { %844 = vst [vmem:[%s1544_s12 + $0x28] sm:$0xff] %v812_v37  ;;  %v824_v6 = vld [vmem:[#allocation2 + $0x58] sm:$0xff]  ;;  %v826_v11 = vld [vmem:[#allocation2 + $0xc8] sm:$0xff]  ;;  %v827_v12 = vld [vmem:[#allocation2 + $0xe0] sm:$0xff]  ;;  %v922_v25 = vmul.f32 %v821_v61, %v821_v61  ;;  %v923_v30 = vmul.f32 %v822_v1, %v822_v1  ;;  %v924_v35 = vmul.f32 %v823_v2, %v823_v2 }
 0x152   : > { %v942_v42 = vadd.f32 %v941_v38, %v911_v36  ;;  %v874_v43 = vadd.f32 %v873_v39, %v811_v33  ;;  %845 = vst [vmem:[%s1544_s12 + $0x30] sm:$0xff] %v813_v41  ;;  %v828_v16 = vld [vmem:[#allocation2 + $0x90] sm:$0xff]  ;;  %v830_v21 = vld [vmem:[#allocation2 + $0xc0] sm:$0xff]  ;;  %v831_v22 = vld [vmem:[#allocation2 + $0xa8] sm:$0xff] }
 0x153   : > { %846 = vst [vmem:[%s1544_s12 + $0x38] sm:$0xff] %v814_v45  ;;  %v829_v17 = vld [vmem:[#allocation2 + $0x70] sm:$0xff]  ;;  %v834_v31 = vld [vmem:[#allocation2 + $0x28] sm:$0xff]  ;;  %v835_v32 = vld [vmem:[#allocation2 + $0xa0] sm:$0xff] }
 0x154   : > { %v943_v47 = vadd.f32 %v942_v42, %v912_v40  ;;  %v875_v48 = vadd.f32 %v874_v43, %v812_v37  ;;  %847 = vst [vmem:[%s1544_s12 + $0x40] sm:$0xff] %v815_v46  ;;  %v832_v26 = vld [vmem:[#allocation2 + $0xd0] sm:$0xff]  ;;  %v836_v36 = vld [vmem:[#allocation2 + $0xf8] sm:$0xff]  ;;  %v837_v37 = vld [vmem:[#allocation2 + $0x20] sm:$0xff]  ;;  %v925_v40 = vmul.f32 %v824_v6, %v824_v6 }
 0x155   : > { %848 = vst [vmem:[%s1544_s12 + $0x48] sm:$0xff] %v816_v50  ;;  %v833_v27 = vld [vmem:[#allocation2 + $0x10] sm:$0xff] }
 0x156   : > { %v944_v52 = vadd.f32 %v943_v47, %v913_v44  ;;  %v876_v53 = vadd.f32 %v875_v48, %v813_v41  ;;  %849 = vst [vmem:[%s1544_s12 + $0x50] sm:$0xff] %v817_v51  ;;  %v838_v41 = vld [vmem:[#allocation2 + $0x98] sm:$0xff]  ;;  %v926_v44 = vmul.f32 %v825_v7, %v825_v7  ;;  %v927_v47 = vmul.f32 %v826_v11, %v826_v11 }
 0x157   : > { %850 = vst [vmem:[%s1544_s12 + $0x58] sm:$0xff] %v818_v55 }
 0x158   : > { %v945_v57 = vadd.f32 %v944_v52, %v914_v49  ;;  %v877_v58 = vadd.f32 %v876_v53, %v814_v45  ;;  %851 = vst [vmem:[%s1544_s12 + $0x60] sm:$0xff] %v819_v56  ;;  %v929_v53 = vmul.f32 %v828_v16, %v828_v16 }
 0x159   : > { %852 = vst [vmem:[%s1544_s12 + $0x68] sm:$0xff] %v820_v60 }
 0x15a   : > { %v946_v62 = vadd.f32 %v945_v57, %v915_v54  ;;  %v878_v63 = vadd.f32 %v877_v58, %v815_v46  ;;  %853 = vst [vmem:[%s1544_s12 + $0x70] sm:$0xff] %v821_v61 }
 0x15b   : > { %854 = vst [vmem:[%s1544_s12 + $0x78] sm:$0xff] %v822_v1 }
 0x15c   : > { %v947_v3 = vadd.f32 %v946_v62, %v916_v59  ;;  %v879_v4 = vadd.f32 %v878_v63, %v816_v50  ;;  %855 = vst [vmem:[%s1544_s12 + $0x80] sm:$0xff] %v823_v2  ;;  %v928_v50 = vmul.f32 %v827_v12, %v827_v12  ;;  %v931_v59 = vmul.f32 %v830_v21, %v830_v21 }
 0x15d   : > { %856 = vst [vmem:[%s1544_s12 + $0x88] sm:$0xff] %v824_v6  ;;  %v932_v62 = vmul.f32 %v831_v22, %v831_v22 }
 0x15e   : > { %v948_v8 = vadd.f32 %v947_v3, %v917_v0  ;;  %v880_v9 = vadd.f32 %v879_v4, %v817_v51  ;;  %857 = vst [vmem:[%s1544_s12 + $0x90] sm:$0xff] %v825_v7  ;;  %v934_v4 = vmul.f32 %v833_v27, %v833_v27 }
 0x15f   : > { %858 = vst [vmem:[%s1544_s12 + $0x98] sm:$0xff] %v826_v11 }
 0x160   : > { %v949_v13 = vadd.f32 %v948_v8, %v918_v5  ;;  %v881_v14 = vadd.f32 %v880_v9, %v818_v55  ;;  %859 = vst [vmem:[%s1544_s12 + $0xa0] sm:$0xff] %v827_v12 }
 0x161   : > { %860 = vst [vmem:[%s1544_s12 + $0xa8] sm:$0xff] %v828_v16 }
 0x162   : > { %v950_v18 = vadd.f32 %v949_v13, %v919_v10  ;;  %v882_v19 = vadd.f32 %v881_v14, %v819_v56  ;;  %861 = vst [vmem:[%s1544_s12 + $0xb0] sm:$0xff] %v829_v17  ;;  %v930_v56 = vmul.f32 %v829_v17, %v829_v17  ;;  %v936_v10 = vmul.f32 %v835_v32, %v835_v32 }
 0x163   : > { %862 = vst [vmem:[%s1544_s12 + $0xb8] sm:$0xff] %v830_v21  ;;  %v937_v13 = vmul.f32 %v836_v36, %v836_v36 }
 0x164   : > { %v951_v23 = vadd.f32 %v950_v18, %v920_v15  ;;  %v883_v24 = vadd.f32 %v882_v19, %v820_v60  ;;  %863 = vst [vmem:[%s1544_s12 + $0xc0] sm:$0xff] %v831_v22  ;;  %v939_v19 = vmul.f32 %v838_v41, %v838_v41 }
 0x165   : > { %864 = vst [vmem:[%s1544_s12 + $0xc8] sm:$0xff] %v832_v26 }
 0x166   : > { %v952_v28 = vadd.f32 %v951_v23, %v921_v20  ;;  %v884_v29 = vadd.f32 %v883_v24, %v821_v61  ;;  %865 = vst [vmem:[%s1544_s12 + $0xd0] sm:$0xff] %v833_v27 }
 0x167   : > { %866 = vst [vmem:[%s1544_s12 + $0xd8] sm:$0xff] %v834_v31 }
 0x168   : > { %v953_v33 = vadd.f32 %v952_v28, %v922_v25  ;;  %v885_v34 = vadd.f32 %v884_v29, %v822_v1  ;;  %867 = vst [vmem:[%s1544_s12 + $0xe0] sm:$0xff] %v835_v32  ;;  %v933_v1 = vmul.f32 %v832_v26, %v832_v26 }
 0x169   : > { %868 = vst [vmem:[%s1544_s12 + $0xe8] sm:$0xff] %v836_v36 }
 0x16a   : > { %v954_v38 = vadd.f32 %v953_v33, %v923_v30  ;;  %v886_v39 = vadd.f32 %v885_v34, %v823_v2  ;;  %869 = vst [vmem:[%s1544_s12 + $0xf0] sm:$0xff] %v837_v37 }
 0x16b   : > { %870 = vst [vmem:[%s1544_s12 + $0xf8] sm:$0xff] %v838_v41 }
 0x16c   : > { %v955_v42 = vadd.f32 %v954_v38, %v924_v35  ;;  %v887_v43 = vadd.f32 %v886_v39, %v824_v6 }
 0x16e   : > { %v956_v45 = vadd.f32 %v955_v42, %v925_v40  ;;  %v888_v46 = vadd.f32 %v887_v43, %v825_v7  ;;  %v935_v7 = vmul.f32 %v834_v31, %v834_v31 }
 0x170   : > { %v957_v48 = vadd.f32 %v956_v45, %v926_v44  ;;  %v889_v49 = vadd.f32 %v888_v46, %v826_v11 }
 0x172   : > { %v958_v51 = vadd.f32 %v957_v48, %v927_v47  ;;  %v890_v52 = vadd.f32 %v889_v49, %v827_v12 }
 0x174   : > { %v959_v54 = vadd.f32 %v958_v51, %v928_v50  ;;  %v891_v55 = vadd.f32 %v890_v52, %v828_v16  ;;  %v938_v16 = vmul.f32 %v837_v37, %v837_v37 }
 0x176   : > { %v960_v57 = vadd.f32 %v959_v54, %v929_v53  ;;  %v892_v58 = vadd.f32 %v891_v55, %v829_v17 }
 0x178   : > { %v961_v60 = vadd.f32 %v960_v57, %v930_v56  ;;  %v893_v61 = vadd.f32 %v892_v58, %v830_v21 }
 0x17a   : > { %v962_v63 = vadd.f32 %v961_v60, %v931_v59  ;;  %v894_v0 = vadd.f32 %v893_v61, %v831_v22 }
 0x17c   : > { %v963_v2 = vadd.f32 %v962_v63, %v932_v62  ;;  %v895_v3 = vadd.f32 %v894_v0, %v832_v26  ;;  %v977_v26 = vlaneseq }
 0x17e   : > { %v964_v5 = vadd.f32 %v963_v2, %v933_v1  ;;  %v896_v6 = vadd.f32 %v895_v3, %v833_v27 }
 0x180   : > { %v965_v8 = vadd.f32 %v964_v5, %v934_v4  ;;  %v897_v9 = vadd.f32 %v896_v6, %v834_v31  ;;  %v978_v31 = vshrl.u32 %v977_v26, 7 }
 0x182   : > { %v966_v11 = vadd.f32 %v965_v8, %v935_v7  ;;  %v898_v12 = vadd.f32 %v897_v9, %v835_v32  ;;  %vm980_vm0 = vcmp.eq.s32.totalorder %v978_v31, 1  ;;  %vm979_vm1 = vcmp.eq.s32.totalorder %v978_v31, 0 }
 0x184   : > { %v967_v14 = vadd.f32 %v966_v11, %v936_v10  ;;  %v899_v15 = vadd.f32 %v898_v12, %v836_v36 }
 0x186   : > { %v968_v17 = vadd.f32 %v967_v14, %v937_v13  ;;  %v900_v18 = vadd.f32 %v899_v15, %v837_v37 }
 0x188   : > { %v969_v20 = vadd.f32 %v968_v17, %v938_v16  ;;  %v901_v21 = vadd.f32 %v900_v18, %v838_v41 }
 0x18a   : > { %v902_v22 = vrot.slane %v901_v21, 4  ;;  %v970_v23 = vadd.f32 %v969_v20, %v939_v19 }
 0x18c   : > { %v903_v24 = vadd.f32 %v902_v22, %v901_v21  ;;  %v971_v25 = vrot.slane %v970_v23, 4 }
 0x18e   : > { %v904_v27 = vrot.slane %v903_v24, 2  ;;  %v972_v28 = vadd.f32 %v971_v25, %v970_v23 }
 0x190   : > { %v905_v29 = vadd.f32 %v904_v27, %v903_v24  ;;  %v973_v30 = vrot.slane %v972_v28, 2 }
 0x192   : > { %v906_v32 = vrot.slane %v905_v29, 1  ;;  %v974_v33 = vadd.f32 %v973_v30, %v972_v28 }
 0x194   : > { %v975_v34 = vrot.slane %v974_v33, 1  ;;  %v907_v35 = vadd.f32 %v906_v32, %v905_v29 }
 0x196   : > { %v976_v36 = vadd.f32 %v975_v34, %v974_v33 }
 0x198   : > { %v981_v37 = vsel %vm980_vm0, %v976_v36, 0.0 }
 0x199   : > { %v982_v38 = vsel %vm979_vm1, %v907_v35, %v981_v37 }
 0x19a   : > { %983 = vst [vmem:[%s1549_s5] sm:$0xff] %v982_v38 }
 0x19b PF: > { %s14_s18 = sadd.s32 1, %s1378_s18   ;;  %s1637_s12 = smov %s1358_s13 }
 0x19c   : > { %p11_p1 = scmp.ge.s32.totalorder %s14_s18, 8   ;;  %s1638_s13 = smov %s1452_s25 }
 0x19d   : > { %s1639_s14 = smov %s1370_s16  ;;  %s1640_s15 = smov %s1374_s17 }
 0x19e   : > { %s1641_s16 = smov %s1644_s19  ;;  %s1642_s17 = smov %s1648_s20 }
 0x19f   :  { %13 = sbr.rel (!%p11_p1) target bundleno = 4 (0x4), region = 127 }

// kernel: down_forward.7
= control target key start
LH: loop header
LB: loop body
LE: loop exit
PB: predicated region body
PF: predicated region fallthrough
CT: control target
= control target key end

     0   :  { %9 = vsyncpa [#allocation3], 0  ;;  %s900_s0 = inlined_call_operand.vmem [shape: f32[512,128], index: 0, kind: input, shape index: {}]   ;;  %s901_s1 = inlined_call_operand.vmem [shape: f32[1,128], index: 1, kind: input, shape index: {}]   ;;  %s902_s2 = inlined_call_operand.vmem [shape: f32[1,128], index: 2, kind: input, shape index: {}]   ;;  %s903_s3 = inlined_call_operand.vmem [shape: f32[1,128], index: 3, kind: input, shape index: {}]   ;;  %s904_s4 = inlined_call_operand.hbm [shape: f32[512,128], index: 4, kind: output, shape index: {}]  }
   0x1   :  { %11 = vsyncpa [#allocation3 + $0x1], 0  ;;  %s629_s15 = smov 0   ;;  %s631_s16 = smov 0  }
   0x2   :  { %s633_s17 = smov 0   ;;  %s635_s18 = smov 0  }
   0x3 LB: > { %s650_s19 = sadd.s32 4294967295, %s600_s18   ;;  %s481_s20 = sadd.s32 4294967294, %s600_s18   ;;  %s600_s18 = sphi %s635_s18, %s910_s18   ;;  %s596_s17 = sphi %s633_s17, %s909_s17   ;;  %s592_s16 = sphi %s631_s16, %s908_s16   ;;  %s588_s15 = sphi %s629_s15, %s907_s15  }
   0x4   : > { %s654_s21 = sadd.s32 1, %s600_s18   ;;  %s113_s22 = sadd.s32 1, %s596_s17 }
   0x5   : > { %s110_s23 = ssub.s32 %s600_s18, %s654_s21  ;;  %p123_p0 = scmp.ne.s32.totalorder %s596_s17, %s592_s16 }
   0x6   : > { %p111_p1 = scmp.eq.s32.totalorder %s110_s23, 0  ;;  %p124_p2 = scmp.eq.s32.totalorder %s650_s19, 1 }
   0x7   : > { %p129_p3 = scmp.ne.s32.totalorder %s592_s16, %s588_s15  ;;  %p130_p4 = scmp.eq.s32.totalorder %s481_s20, 1 }
   0x8   : > { %s665_s24 = scalar_select %p111_p1, %s596_s17, %s113_s22  }
   0x9   : > { %p667_p5 = por %p124_p2, %p123_p0  ;;  %p671_p6 = por %p130_p4, %p129_p3 }
   0xa   : > { %p484_p7 = scmp.ge.s32.totalorder %s600_s18, 1  ;;  %p166_p8 = scmp.lt.s32.totalorder %s600_s18, 3 }
   0xc   : > { %p167_p9 = pnand %p484_p7, %p166_p8 }
   0xd   : > { %s486_s27 = sshll.u32 (!%p167_p9), %s650_s19, 5  ;;  %s189_s5 = sand.u32 (!%p167_p9), 1, %s592_s16  }
   0xe   : > { %170 = sbr.rel (%p167_p9) target bundleno = 66 (0x42), region = 36  ;;  %p193_p10 = scmp.lt.s32.totalorder (!%p167_p9), %s486_s27, 63 }
   0xf   : > { %s705_s11 = sshll.u32 (!%p167_p9), %s189_s5, 8  ;;  %s493_s20 = sshll.u32 (!%p167_p9), %s650_s19, 8 }
  0x10   : > { %s741_s14 = scalar_lea.vmem (!%p167_p9), [#allocation2], %s705_s11  ;;  %s415_s23 = scalar_lea.hbm (!%p167_p9), %s904_s4, %s493_s20 }
  0x11   : > { %s418_s28 = sshll.u32 (!%p167_p9), %s415_s23, 4  ;;  %s404_s29 = scalar_lea.sflag (!%p167_p9), [#allocation3], %s189_s5  ;;  %s419_s28 = int_to_ptr.hbm [resolvable:$true] %s418_s28 }
  0x12   : > { %s558_s9 = scalar_lea.hbm (!%p167_p9), %s904_s4, 512 }
  0x13   : > { %s912_s27 = smov (!%p193_p10, %s486_s27), 63  ;;  %v681_v0 = vld [vmem:[%s901_s1] ss:$0 sm:$0xff] }
  0x14   : > { %s487_s30 = sshll.u32 %s912_s27, 3  ;;  %v692_v1 = vld [vmem:[%s902_s2] ss:$0 sm:$0xff]  ;;  %s416_s27 = sshll.u32 %s741_s14, 4  ;;  %s417_s27 = int_to_ptr.vmem [resolvable:$true] %s416_s27 }
  0x15   : > { %s687_s8 = scalar_lea.vmem %s900_s0, %s487_s30  ;;  %v716_v17 = vld [vmem:[%s903_s3] ss:$0 sm:$0xff]  ;;  %s552_s30 = sshra.s32 %s419_s28, 4  ;;  %s553_s30 = int_to_ptr.hbm [resolvable:$true] %s552_s30 }
  0x16   : > { %v199_v2 = vld [vmem:[%s687_s8] sm:$0xff]  ;;  %v200_v3 = vld [vmem:[%s687_s8 + $0x8] sm:$0xff]  ;;  %v201_v4 = vld [vmem:[%s687_s8 + $0x10] sm:$0xff]  ;;  %s554_s6 = scalar_lea.hbm %s553_s30, 256  ;;  %p559_p0 = scmp.lt.s32.totalorder %s553_s30, %s904_s4 }
  0x17   : > { %v235_v5 = vmul.f32 %v681_v0, %v199_v2  ;;  %v236_v6 = vmul.f32 %v681_v0, %v200_v3  ;;  %v237_v7 = vmul.f32 %v681_v0, %v201_v4  ;;  %v202_v8 = vld [vmem:[%s687_s8 + $0x18] sm:$0xff]  ;;  %v203_v9 = vld [vmem:[%s687_s8 + $0x20] sm:$0xff]  ;;  %v204_v10 = vld [vmem:[%s687_s8 + $0x28] sm:$0xff]  ;;  %p555_p11 = scmp.ne.s32.totalorder %s553_s30, %s554_s6  ;;  %p560_p1 = scmp.lt.s32.totalorder %s558_s9, %s554_s6 }
  0x18   : > { %v238_v11 = vmul.f32 %v681_v0, %v202_v8  ;;  %v239_v12 = vmul.f32 %v681_v0, %v203_v9  ;;  %v240_v13 = vmul.f32 %v681_v0, %v204_v10  ;;  %v205_v14 = vld [vmem:[%s687_s8 + $0x30] sm:$0xff]  ;;  %v206_v15 = vld [vmem:[%s687_s8 + $0x38] sm:$0xff]  ;;  %v207_v33 = vld [vmem:[%s687_s8 + $0x40] sm:$0xff] }
  0x19   : > { %v271_v16 = vadd.f32 %v692_v1, %v235_v5  ;;  %v272_v18 = vadd.f32 %v692_v1, %v236_v6  ;;  %v273_v19 = vadd.f32 %v692_v1, %v237_v7  ;;  %v241_v20 = vmul.f32 %v681_v0, %v205_v14  ;;  %v208_v34 = vld [vmem:[%s687_s8 + $0x48] sm:$0xff]  ;;  %v209_v35 = vld [vmem:[%s687_s8 + $0x50] sm:$0xff]  ;;  %v210_v40 = vld [vmem:[%s687_s8 + $0x58] sm:$0xff]  ;;  %p556_p12 = pnand %p555_p11, %p667_p5  ;;  %p561_p2 = por %p560_p1, %p559_p0 }
  0x1a   : > { %v274_v21 = vadd.f32 %v692_v1, %v238_v11  ;;  %v275_v22 = vadd.f32 %v692_v1, %v239_v12  ;;  %v276_v23 = vadd.f32 %v692_v1, %v240_v13  ;;  %v242_v24 = vmul.f32 %v681_v0, %v206_v15  ;;  %v211_v41 = vld [vmem:[%s687_s8 + $0x60] sm:$0xff]  ;;  %v212_v42 = vld [vmem:[%s687_s8 + $0x68] sm:$0xff]  ;;  %v213_v47 = vld [vmem:[%s687_s8 + $0x70] sm:$0xff] }
  0x1b   : > { %v303_v25 = vmax.f32 %v271_v16, 0.0  ;;  %v304_v26 = vmax.f32 %v272_v18, 0.0  ;;  %v305_v27 = vmax.f32 %v273_v19, 0.0  ;;  %v277_v28 = vadd.f32 %v692_v1, %v241_v20  ;;  %v214_v52 = vld [vmem:[%s687_s8 + $0x78] sm:$0xff]  ;;  %v215_v7 = vld [vmem:[%s687_s8 + $0x80] sm:$0xff]  ;;  %v216_v12 = vld [vmem:[%s687_s8 + $0x88] sm:$0xff]  ;;  %p557_p13 = pneg %p556_p12 }
  0x1c   : > { %v306_v29 = vmax.f32 %v274_v21, 0.0  ;;  %v307_v30 = vmax.f32 %v275_v22, 0.0  ;;  %v308_v31 = vmax.f32 %v276_v23, 0.0  ;;  %v278_v32 = vadd.f32 %v692_v1, %v242_v24  ;;  %v217_v13 = vld [vmem:[%s687_s8 + $0x90] sm:$0xff]  ;;  %v218_v19 = vld [vmem:[%s687_s8 + $0x98] sm:$0xff]  ;;  %v219_v20 = vld [vmem:[%s687_s8 + $0xa0] sm:$0xff] }
  0x1d   : > { %v339_v36 = vadd.f32 %v716_v17, %v303_v25  ;;  %v340_v37 = vadd.f32 %v716_v17, %v304_v26  ;;  %v341_v38 = vadd.f32 %v716_v17, %v305_v27  ;;  %v309_v39 = vmax.f32 %v277_v28, 0.0  ;;  %v220_v21 = vld [vmem:[%s687_s8 + $0xa8] sm:$0xff]  ;;  %v221_v26 = vld [vmem:[%s687_s8 + $0xb0] sm:$0xff]  ;;  %p562_p3 = pnand %p561_p2, %p557_p13 }
  0x1e   : > { %v342_v43 = vadd.f32 %v716_v17, %v306_v29  ;;  %v343_v44 = vadd.f32 %v716_v17, %v307_v30  ;;  %v344_v45 = vadd.f32 %v716_v17, %v308_v31  ;;  %v310_v46 = vmax.f32 %v278_v32, 0.0  ;;  %v222_v31 = vld [vmem:[%s687_s8 + $0xb8] sm:$0xff] }
  0x1f   : > { %371 = vst [vmem:[%s741_s14] sm:$0xff] %v339_v36  ;;  %v345_v48 = vadd.f32 %v716_v17, %v309_v39  ;;  %v243_v49 = vmul.f32 %v681_v0, %v207_v33  ;;  %v244_v50 = vmul.f32 %v681_v0, %v208_v34  ;;  %v245_v51 = vmul.f32 %v681_v0, %v209_v35 }
  0x20   : > { %372 = vst [vmem:[%s741_s14 + $0x8] sm:$0xff] %v340_v37  ;;  %v346_v53 = vadd.f32 %v716_v17, %v310_v46  ;;  %v246_v54 = vmul.f32 %v681_v0, %v210_v40  ;;  %v247_v55 = vmul.f32 %v681_v0, %v211_v41  ;;  %v248_v56 = vmul.f32 %v681_v0, %v212_v42 }
  0x21   : > { %373 = vst [vmem:[%s741_s14 + $0x10] sm:$0xff] %v341_v38  ;;  %v279_v57 = vadd.f32 %v692_v1, %v243_v49  ;;  %v280_v58 = vadd.f32 %v692_v1, %v244_v50  ;;  %v281_v59 = vadd.f32 %v692_v1, %v245_v51  ;;  %v249_v60 = vmul.f32 %v681_v0, %v213_v47 }
  0x22   : > { %374 = vst [vmem:[%s741_s14 + $0x18] sm:$0xff] %v342_v43  ;;  %v282_v61 = vadd.f32 %v692_v1, %v246_v54  ;;  %v283_v62 = vadd.f32 %v692_v1, %v247_v55  ;;  %v284_v63 = vadd.f32 %v692_v1, %v248_v56  ;;  %v250_v2 = vmul.f32 %v681_v0, %v214_v52  ;;  %v225_v54 = vld [vmem:[%s687_s8 + $0xd0] sm:$0xff] }
  0x23   : > { %375 = vst [vmem:[%s741_s14 + $0x20] sm:$0xff] %v343_v44  ;;  %v311_v3 = vmax.f32 %v279_v57, 0.0  ;;  %v312_v4 = vmax.f32 %v280_v58, 0.0  ;;  %v313_v5 = vmax.f32 %v281_v59, 0.0  ;;  %v285_v6 = vadd.f32 %v692_v1, %v249_v60  ;;  %v226_v59 = vld [vmem:[%s687_s8 + $0xd8] sm:$0xff]  ;;  %v227_v60 = vld [vmem:[%s687_s8 + $0xe0] sm:$0xff] }
  0x24   : > { %376 = vst [vmem:[%s741_s14 + $0x28] sm:$0xff] %v344_v45  ;;  %v314_v8 = vmax.f32 %v282_v61, 0.0  ;;  %v315_v9 = vmax.f32 %v283_v62, 0.0  ;;  %v316_v10 = vmax.f32 %v284_v63, 0.0  ;;  %v286_v11 = vadd.f32 %v692_v1, %v250_v2  ;;  %v228_v61 = vld [vmem:[%s687_s8 + $0xe8] sm:$0xff] }
  0x25   : > { %377 = vst [vmem:[%s741_s14 + $0x30] sm:$0xff] %v345_v48  ;;  %v347_v14 = vadd.f32 %v716_v17, %v311_v3  ;;  %v348_v15 = vadd.f32 %v716_v17, %v312_v4  ;;  %v349_v16 = vadd.f32 %v716_v17, %v313_v5  ;;  %v317_v18 = vmax.f32 %v285_v6, 0.0  ;;  %v223_v48 = vld [vmem:[%s687_s8 + $0xc0] sm:$0xff]  ;;  %v229_v4 = vld [vmem:[%s687_s8 + $0xf0] sm:$0xff] }
  0x26   : > { %378 = vst [vmem:[%s741_s14 + $0x38] sm:$0xff] %v346_v53  ;;  %v350_v22 = vadd.f32 %v716_v17, %v314_v8  ;;  %v351_v23 = vadd.f32 %v716_v17, %v315_v9  ;;  %v352_v24 = vadd.f32 %v716_v17, %v316_v10  ;;  %v318_v25 = vmax.f32 %v286_v11, 0.0  ;;  %v224_v53 = vld [vmem:[%s687_s8 + $0xc8] sm:$0xff]  ;;  %v230_v9 = vld [vmem:[%s687_s8 + $0xf8] sm:$0xff] }
  0x27   : > { %379 = vst [vmem:[%s741_s14 + $0x40] sm:$0xff] %v347_v14  ;;  %v353_v27 = vadd.f32 %v716_v17, %v317_v18  ;;  %v251_v28 = vmul.f32 %v681_v0, %v215_v7  ;;  %v252_v29 = vmul.f32 %v681_v0, %v216_v12  ;;  %v253_v30 = vmul.f32 %v681_v0, %v217_v13 }
  0x28   : > { %380 = vst [vmem:[%s741_s14 + $0x48] sm:$0xff] %v348_v15  ;;  %v354_v32 = vadd.f32 %v716_v17, %v318_v25  ;;  %v254_v33 = vmul.f32 %v681_v0, %v218_v19  ;;  %v255_v34 = vmul.f32 %v681_v0, %v219_v20  ;;  %v256_v35 = vmul.f32 %v681_v0, %v220_v21 }
  0x29   : > { %381 = vst [vmem:[%s741_s14 + $0x50] sm:$0xff] %v349_v16  ;;  %v287_v36 = vadd.f32 %v692_v1, %v251_v28  ;;  %v288_v37 = vadd.f32 %v692_v1, %v252_v29  ;;  %v289_v38 = vadd.f32 %v692_v1, %v253_v30  ;;  %v257_v39 = vmul.f32 %v681_v0, %v221_v26 }
  0x2a   : > { %382 = vst [vmem:[%s741_s14 + $0x58] sm:$0xff] %v350_v22  ;;  %v290_v40 = vadd.f32 %v692_v1, %v254_v33  ;;  %v291_v41 = vadd.f32 %v692_v1, %v255_v34  ;;  %v292_v42 = vadd.f32 %v692_v1, %v256_v35  ;;  %v258_v43 = vmul.f32 %v681_v0, %v222_v31 }
  0x2b   : > { %383 = vst [vmem:[%s741_s14 + $0x60] sm:$0xff] %v351_v23  ;;  %v319_v44 = vmax.f32 %v287_v36, 0.0  ;;  %v320_v45 = vmax.f32 %v288_v37, 0.0  ;;  %v321_v46 = vmax.f32 %v289_v38, 0.0  ;;  %v293_v47 = vadd.f32 %v692_v1, %v257_v39 }
  0x2c   : > { %384 = vst [vmem:[%s741_s14 + $0x68] sm:$0xff] %v352_v24  ;;  %v322_v49 = vmax.f32 %v290_v40, 0.0  ;;  %v323_v50 = vmax.f32 %v291_v41, 0.0  ;;  %v324_v51 = vmax.f32 %v292_v42, 0.0  ;;  %v294_v52 = vadd.f32 %v692_v1, %v258_v43 }
  0x2d   : > { %385 = vst [vmem:[%s741_s14 + $0x70] sm:$0xff] %v353_v27  ;;  %v355_v55 = vadd.f32 %v716_v17, %v319_v44  ;;  %v356_v56 = vadd.f32 %v716_v17, %v320_v45  ;;  %v357_v57 = vadd.f32 %v716_v17, %v321_v46  ;;  %v325_v58 = vmax.f32 %v293_v47, 0.0 }
  0x2e   : > { %386 = vst [vmem:[%s741_s14 + $0x78] sm:$0xff] %v354_v32  ;;  %v358_v62 = vadd.f32 %v716_v17, %v322_v49  ;;  %v359_v63 = vadd.f32 %v716_v17, %v323_v50  ;;  %v360_v2 = vadd.f32 %v716_v17, %v324_v51  ;;  %v326_v3 = vmax.f32 %v294_v52, 0.0 }
  0x2f   : > { %387 = vst [vmem:[%s741_s14 + $0x80] sm:$0xff] %v355_v55  ;;  %v361_v5 = vadd.f32 %v716_v17, %v325_v58  ;;  %v259_v6 = vmul.f32 %v681_v0, %v223_v48  ;;  %v260_v7 = vmul.f32 %v681_v0, %v224_v53  ;;  %v261_v8 = vmul.f32 %v681_v0, %v225_v54 }
  0x30   : > { %388 = vst [vmem:[%s741_s14 + $0x88] sm:$0xff] %v356_v56  ;;  %v362_v10 = vadd.f32 %v716_v17, %v326_v3  ;;  %v262_v11 = vmul.f32 %v681_v0, %v226_v59  ;;  %v263_v12 = vmul.f32 %v681_v0, %v227_v60  ;;  %v264_v13 = vmul.f32 %v681_v0, %v228_v61 }
  0x31   : > { %389 = vst [vmem:[%s741_s14 + $0x90] sm:$0xff] %v357_v57  ;;  %v295_v14 = vadd.f32 %v692_v1, %v259_v6  ;;  %v296_v15 = vadd.f32 %v692_v1, %v260_v7  ;;  %v297_v16 = vadd.f32 %v692_v1, %v261_v8  ;;  %v265_v18 = vmul.f32 %v681_v0, %v229_v4 }
  0x32   : > { %390 = vst [vmem:[%s741_s14 + $0x98] sm:$0xff] %v358_v62  ;;  %v298_v19 = vadd.f32 %v692_v1, %v262_v11  ;;  %v299_v20 = vadd.f32 %v692_v1, %v263_v12  ;;  %v300_v21 = vadd.f32 %v692_v1, %v264_v13  ;;  %v266_v22 = vmul.f32 %v681_v0, %v230_v9 }
  0x33   : > { %391 = vst [vmem:[%s741_s14 + $0xa0] sm:$0xff] %v359_v63  ;;  %v327_v23 = vmax.f32 %v295_v14, 0.0  ;;  %v328_v24 = vmax.f32 %v296_v15, 0.0  ;;  %v329_v25 = vmax.f32 %v297_v16, 0.0  ;;  %v301_v26 = vadd.f32 %v692_v1, %v265_v18 }
  0x34   : > { %392 = vst [vmem:[%s741_s14 + $0xa8] sm:$0xff] %v360_v2  ;;  %v330_v27 = vmax.f32 %v298_v19, 0.0  ;;  %v331_v28 = vmax.f32 %v299_v20, 0.0  ;;  %v332_v29 = vmax.f32 %v300_v21, 0.0  ;;  %v302_v30 = vadd.f32 %v692_v1, %v266_v22 }
  0x35   : > { %393 = vst [vmem:[%s741_s14 + $0xb0] sm:$0xff] %v361_v5  ;;  %v363_v0 = vadd.f32 %v716_v17, %v327_v23  ;;  %v364_v31 = vadd.f32 %v716_v17, %v328_v24  ;;  %v365_v32 = vadd.f32 %v716_v17, %v329_v25  ;;  %v333_v33 = vmax.f32 %v301_v26, 0.0 }
  0x36   : > { %394 = vst [vmem:[%s741_s14 + $0xb8] sm:$0xff] %v362_v10  ;;  %v366_v34 = vadd.f32 %v716_v17, %v330_v27  ;;  %v334_v35 = vmax.f32 %v302_v30, 0.0  ;;  %v367_v1 = vadd.f32 %v716_v17, %v331_v28  ;;  %v368_v36 = vadd.f32 %v716_v17, %v332_v29 }
  0x37   : > { %395 = vst [vmem:[%s741_s14 + $0xc0] sm:$0xff] %v363_v0  ;;  %v369_v37 = vadd.f32 %v716_v17, %v333_v33 }
  0x38   : > { %396 = vst [vmem:[%s741_s14 + $0xc8] sm:$0xff] %v364_v31  ;;  %v370_v38 = vadd.f32 %v716_v17, %v334_v35 }
  0x39   : > { %397 = vst [vmem:[%s741_s14 + $0xd0] sm:$0xff] %v365_v32 }
  0x3a   : > { %398 = vst [vmem:[%s741_s14 + $0xd8] sm:$0xff] %v366_v34 }
  0x3b   : > { %399 = vst [vmem:[%s741_s14 + $0xe0] sm:$0xff] %v367_v1 }
  0x3c   : > { %400 = vst [vmem:[%s741_s14 + $0xe8] sm:$0xff] %v368_v36 }
  0x3d   : > { %401 = vst [vmem:[%s741_s14 + $0xf0] sm:$0xff] %v369_v37 }
  0x3e   : > { %402 = vst [vmem:[%s741_s14 + $0xf8] sm:$0xff] %v370_v38 }
  0x3f   : > { %565 = shalt.err (!%p562_p3)
}
  0x40   : > { %s602_s5 = smov 128   ;;  %s603_s12 = smov 8  }
  0x41   : > { %494 = dma.vmem_to_hbm [thread:$0]  (%p667_p5), %s417_s27, 4096, %s419_s28, %s404_s29, %s602_s5, %s602_s5, %s603_s12  }
  0x42 PF: > { %p500_p4 = scmp.ge.s32.totalorder %s600_s18, 2  ;;  %s433_s13 = sand.u32 1, %s588_s15  }
  0x43   : > { %s434_s14 = scalar_lea.sflag [#allocation3], %s433_s13 }
  0x44   : > { %p497_p7 = pnand %p500_p4, %p671_p6 }
  0x46   : > { %p498_p8 = pneg %p497_p7 }
  0x48   : > { %583 = dma.done.wait (%p498_p8), %s434_s14, 4096  }
  0x49   : > { %585 = vsyncadd (%p498_p8), %s434_s14, 4294963200  ;;  %p14_p9 = scmp.ge.s32.totalorder %s654_s21, 4   ;;  %s907_s15 = smov %s592_s16 }
  0x4a   : > { %s908_s16 = smov %s596_s17  ;;  %s909_s17 = smov %s665_s24 }
  0x4b   : > { %s910_s18 = smov %s654_s21  ;;  %16 = sbr.rel (!%p14_p9) target bundleno = 3 (0x3), region = 71 }
  0x50   :  { %440 = vsyncpa [#allocation3], 1 }
  0x51   :  { %442 = vsyncpa [#allocation3 + $0x1], 1 }

</bundles_post_ra>
